<compile_context>
chip_gen: v6e
topology: v6e:2x2x1
jax: 0.10.0
libtpu: 0.0.40
codegen_flags: <defaults>
</compile_context>

<pallas_src>
import numpy as np
import jax
import jax.numpy as jnp
from jax.experimental import pallas as pl
from jax.experimental.pallas import tpu as pltpu


def make_aspp_kernel(Cin, Bout):
    """All sizes are static; Bout = (1 + n_rates) * Cout."""

    def kernel(x_ref, wb_ref, bcat_ref, wp_ref, bp_ref,
               wprojm_ref, wprojg_ref, bproj_ref, o_ref):
        xb = x_ref[0]                                             # (HW, Kb) bf16

        # All 1x1 + atrous-3x3 branch pre-activations in one block-diagonal
        # matmul (BN scales already folded into wb); bias + ReLU epilogue.
        y = jnp.dot(xb, wb_ref[...], preferred_element_type=jnp.float32)  # (HW, Bout) f32
        r = jnp.maximum(y + bcat_ref[...], 0.0).astype(jnp.bfloat16)      # (HW, Bout) bf16

        # Global-average-pool branch: mean of the raw input columns (first Cin
        # lanes of the im2col slab), accumulated in f32, then folded into the
        # projection bias via the sproj-scaled wproj rows.
        xm = jnp.mean(xb[:, 0:Cin].astype(jnp.float32), axis=0, keepdims=True)  # (1, Cin)
        yp = jnp.dot(xm.astype(jnp.bfloat16), wp_ref[...],
                     preferred_element_type=jnp.float32)
        rp = jnp.maximum(yp + bp_ref[...], 0.0)                    # (1, Cout) f32
        bias_eff = bproj_ref[...] + jnp.dot(rp.astype(jnp.bfloat16), wprojg_ref[...],
                                            preferred_element_type=jnp.float32)

        # Fused projection of the concatenated branch activations (single K=Bout dot).
        out = jnp.maximum(
            jnp.dot(r, wprojm_ref[...], preferred_element_type=jnp.float32) + bias_eff,
            0.0)                                                   # (HW, Cout) f32
        # TODO(synk): nn.Dropout(dropout_rate) — default rate 0 => identity.
        o_ref[0] = out

    return kernel


def aspp_pallas(x_nhwc, params, rates):
    N, H, W, Cin = x_nhwc.shape
    Cout = params["w1"].shape[1]
    n_rates = len(rates)
    HW = H * W
    Bout = (1 + n_rates) * Cout          # concatenated non-pool branch channels
    Kb = Cin * (1 + 9 * n_rates)         # im2col slab width

    bf16 = jnp.bfloat16
    xb = x_nhwc.astype(bf16)

    # Wrapper-side im2col (lane-dense slab).  Tap order per rate: ky-major, kx,
    # then Cin — matches the (3,3,Cin,Cout) -> (9*Cin,Cout) weight reshape below.
    cols = [xb]
    for d in rates:
        xpad = jnp.pad(xb, ((0, 0), (d, d), (d, d), (0, 0)))
        for ky in range(3):
            for kx in range(3):
                cols.append(xpad[:, ky * d:ky * d + H, kx * d:kx * d + W, :])
    xbig = jnp.concatenate(cols, axis=-1).reshape(N, HW, Kb)       # bf16

    # Fold BN scales into weights; block-diagonal branch weight (Kb, Bout).
    wbig = jnp.zeros((Kb, Bout), jnp.float32)
    wbig = wbig.at[0:Cin, 0:Cout].set(params["w1"] * params["s1"])
    off = Cin
    for i in range(n_rates):
        w3f = params["w3"][i].reshape(9 * Cin, Cout) * params["s3"][i]
        wbig = wbig.at[off:off + 9 * Cin, (1 + i) * Cout:(2 + i) * Cout].set(w3f)
        off += 9 * Cin
    wbig = wbig.astype(bf16)
    bcat = jnp.concatenate([params["b1"]] + list(params["b3"]), axis=-1)  # (1, Bout) f32

    wp = (params["wp"] * params["sp"]).astype(bf16)
    bp = params["bp"]
    wproj_s = params["wproj"] * params["sproj"]                    # sproj folded in (f32)
    wproj_main = wproj_s[0:Bout].astype(bf16)                      # non-pool branch rows
    wproj_gap = wproj_s[Bout:Bout + Cout].astype(bf16)             # pooling branch rows
    bproj = params["bproj"]

    inputs = [xbig, wbig, bcat, wp, bp, wproj_main, wproj_gap, bproj]

    def const_spec(a):
        nd = a.ndim
        return pl.BlockSpec(a.shape, lambda n, nd=nd: (0,) * nd)

    in_specs = [pl.BlockSpec((1, HW, Kb), lambda n: (n, 0, 0))]
    in_specs += [const_spec(a) for a in inputs[1:]]

    flops = 2 * N * HW * (Kb * Bout + Bout * Cout)
    bytes_accessed = int(
        sum(int(np.prod(a.shape)) * a.dtype.itemsize for a in inputs)
        + N * HW * Cout * 4)

    kernel = make_aspp_kernel(Cin, Bout)
    out = pl.pallas_call(
        kernel,
        out_shape=jax.ShapeDtypeStruct((N, HW, Cout), jnp.float32),
        grid=(N,),
        in_specs=in_specs,
        out_specs=pl.BlockSpec((1, HW, Cout), lambda n: (n, 0, 0)),
        compiler_params=pltpu.CompilerParams(dimension_semantics=("parallel",)),
        cost_estimate=pl.CostEstimate(flops=flops, transcendentals=0,
                                      bytes_accessed=bytes_accessed),
    )(*inputs)
    return out.reshape(N, H, W, Cout)


# ----------------------------- parameter init -------------------------------
def init_params(key, Cin, Cout, rates):
    n_branches = 1 + len(rates) + 1

    def bf16r(w):  # round weights to bf16-representable values (kernel uses bf16)
        return w.astype(jnp.bfloat16).astype(jnp.float32)

    def bn(k, c):
        k1, k2, k3, k4 = jax.random.split(k, 4)
        gamma = jax.random.uniform(k1, (c,), jnp.float32, 0.5, 1.5)
        beta = 0.1 * jax.random.normal(k2, (c,), jnp.float32)
        mean = 0.1 * jax.random.normal(k3, (c,), jnp.float32)
        var = jax.random.uniform(k4, (c,), jnp.float32, 0.5, 1.5)
        scale = gamma / jnp.sqrt(var + 1e-5)
        bias = beta - mean * scale
        return scale.reshape(1, c), bias.reshape(1, c)

    ks = iter(jax.random.split(key, 4 + 2 * len(rates) + 8))
    p = {}
    p["w1"] = bf16r(jax.random.normal(next(ks), (Cin, Cout), jnp.float32) / np.sqrt(Cin))
    p["s1"], p["b1"] = bn(next(ks), Cout)
    p["w3"], p["s3"], p["b3"] = [], [], []
    for _ in rates:
        w = jax.random.normal(next(ks), (3, 3, Cin, Cout), jnp.float32) / np.sqrt(9 * Cin)
        p["w3"].append(bf16r(w))
        s, b = bn(next(ks), Cout)
        p["s3"].append(s)
        p["b3"].append(b)
    p["wp"] = bf16r(jax.random.normal(next(ks), (Cin, Cout), jnp.float32) / np.sqrt(Cin))
    p["sp"], p["bp"] = bn(next(ks), Cout)
    p["wproj"] = bf16r(jax.random.normal(next(ks), (n_branches * Cout, Cout), jnp.float32)
                       / np.sqrt(n_branches * Cout))
    p["sproj"], p["bproj"] = bn(next(ks), Cout)
    return p


# ------------------------------ pure-JAX reference ---------------------------
def aspp_reference(x, p, rates):
    def bnrelu(y, s, b):
        return jnp.maximum(y * s + b, 0.0)

    N, H, W, Cin = x.shape
    Cout = p["w1"].shape[1]
    outs = [bnrelu(jnp.einsum("nhwc,cd->nhwd", x, p["w1"]), p["s1"], p["b1"])]
    for i, d in enumerate(rates):
        y = jax.lax.conv_general_dilated(
            x, p["w3"][i], window_strides=(1, 1), padding=[(d, d), (d, d)],
            rhs_dilation=(d, d), dimension_numbers=("NHWC", "HWIO", "NHWC"))
        outs.append(bnrelu(y, p["s3"][i], p["b3"][i]))
    xm = jnp.mean(x, axis=(1, 2), keepdims=True)
    yp = bnrelu(jnp.einsum("nhwc,cd->nhwd", xm, p["wp"]), p["sp"], p["bp"])
    outs.append(jnp.broadcast_to(yp, (N, H, W, Cout)))
    cat = jnp.concatenate(outs, axis=-1)
    return bnrelu(jnp.einsum("nhwc,cd->nhwd", cat, p["wproj"]),
                  p["sproj"], p["bproj"])


if __name__ == "__main__":
    key = jax.random.PRNGKey(0)
    kx, kp = jax.random.split(key)

    N, Cin, H, W = 2, 4, 16, 16          # PyTorch NCHW input shape: (2, 4, 16, 16)
    Cout = 128                           # keep the channel (lane) axis dense on TPU
    rates = [2, 4, 6]                    # small atrous rates for the small test

    x_nchw = jax.random.normal(kx, (N, Cin, H, W), jnp.float32)
    x_nhwc = jnp.transpose(x_nchw, (0, 2, 3, 1))
    params = init_params(kp, Cin, Cout, rates)

    out = jax.block_until_ready(aspp_pallas(x_nhwc, params, rates))
    ref = jax.block_until_ready(aspp_reference(x_nhwc, params, rates))

    out_np, ref_np = np.asarray(out), np.asarray(ref)
    diff = float(np.max(np.abs(out_np - ref_np)))
    if not np.allclose(out_np, ref_np, rtol=3e-2, atol=3e-2):
        raise AssertionError(f"Pallas ASPP mismatch vs reference, max|diff|={diff}")

    print("KERNEL_OK")
</pallas_src>

<mosaic_0001>
module attributes {stable_mosaic.version = 11 : i64} {
  func.func @kernel(%arg0: i32, %arg1: memref<1x256x112xbf16, #tpu.memory_space<vmem>>, %arg2: memref<112x512xbf16, #tpu.memory_space<vmem>>, %arg3: memref<1x512xf32, #tpu.memory_space<vmem>>, %arg4: memref<4x128xbf16, #tpu.memory_space<vmem>>, %arg5: memref<1x128xf32, #tpu.memory_space<vmem>>, %arg6: memref<512x128xbf16, #tpu.memory_space<vmem>>, %arg7: memref<128x128xbf16, #tpu.memory_space<vmem>>, %arg8: memref<1x128xf32, #tpu.memory_space<vmem>>, %arg9: memref<1x256x128xf32, #tpu.memory_space<vmem>>) attributes {dimension_semantics = [#tpu.dimension_semantics<parallel>], iteration_bounds = array<i64: 2>, scalar_prefetch = 0 : i64, scratch_operands = 0 : i64, tpu.core_type = #tpu.core_type<tc>, window_params = [{transform_indices = @transform_0, window_bounds = array<i64: 1, 256, 112>}, {pipeline_mode = #tpu.pipeline_mode<synchronous>, transform_indices = @transform_1, window_bounds = array<i64: 112, 512>}, {pipeline_mode = #tpu.pipeline_mode<synchronous>, transform_indices = @transform_2, window_bounds = array<i64: 1, 512>}, {pipeline_mode = #tpu.pipeline_mode<synchronous>, transform_indices = @transform_3, window_bounds = array<i64: 4, 128>}, {pipeline_mode = #tpu.pipeline_mode<synchronous>, transform_indices = @transform_4, window_bounds = array<i64: 1, 128>}, {pipeline_mode = #tpu.pipeline_mode<synchronous>, transform_indices = @transform_5, window_bounds = array<i64: 512, 128>}, {pipeline_mode = #tpu.pipeline_mode<synchronous>, transform_indices = @transform_6, window_bounds = array<i64: 128, 128>}, {pipeline_mode = #tpu.pipeline_mode<synchronous>, transform_indices = @transform_7, window_bounds = array<i64: 1, 128>}, {transform_indices = @transform_8, window_bounds = array<i64: 1, 256, 128>}]} {
    %c0 = arith.constant 0 : index
    %c0_0 = arith.constant 0 : index
    %c0_1 = arith.constant 0 : index
    %0 = vector.load %arg1[%c0, %c0_0, %c0_1] : memref<1x256x112xbf16, #tpu.memory_space<vmem>>, vector<1x256x112xbf16>
    %1 = vector.shape_cast %0 : vector<1x256x112xbf16> to vector<256x112xbf16>
    %c0_2 = arith.constant 0 : index
    %c0_3 = arith.constant 0 : index
    %2 = vector.load %arg2[%c0_2, %c0_3] : memref<112x512xbf16, #tpu.memory_space<vmem>>, vector<112x512xbf16>
    %cst = arith.constant dense<0.000000e+00> : vector<256x512xf32>
    %3 = tpu.matmul %1, %2, %cst {dimension_numbers = #tpu.dot_dimension_numbers<[1], [0], [0], [1], [0, 0, 1, 1], [], []>} : vector<256x112xbf16>, vector<112x512xbf16>, vector<256x512xf32> -> vector<256x512xf32>
    %c0_4 = arith.constant 0 : index
    %c0_5 = arith.constant 0 : index
    %4 = vector.load %arg3[%c0_4, %c0_5] : memref<1x512xf32, #tpu.memory_space<vmem>>, vector<1x512xf32>
    %5 = vector.broadcast %4 : vector<1x512xf32> to vector<256x512xf32>
    %6 = arith.addf %3, %5 : vector<256x512xf32>
    %cst_6 = arith.constant 0.000000e+00 : f32
    %7 = vector.broadcast %cst_6 : f32 to vector<256x512xf32>
    %8 = arith.maximumf %6, %7 : vector<256x512xf32>
    %9 = arith.truncf %8 : vector<256x512xf32> to vector<256x512xbf16>
    %10 = vector.extract_strided_slice %1 {offsets = [0, 0], sizes = [256, 4], strides = [1, 1]} : vector<256x112xbf16> to vector<256x4xbf16>
    %11 = arith.extf %10 : vector<256x4xbf16> to vector<256x4xf32>
    %cst_7 = arith.constant dense<0.000000e+00> : vector<4xf32>
    %12 = vector.multi_reduction <add>, %11, %cst_7 [0] : vector<256x4xf32> to vector<4xf32>
    %13 = vector.shape_cast %12 : vector<4xf32> to vector<1x4xf32>
    %cst_8 = arith.constant 2.560000e+02 : f32
    %14 = vector.broadcast %cst_8 : f32 to vector<1x4xf32>
    %15 = arith.divf %13, %14 : vector<1x4xf32>
    %16 = arith.truncf %15 : vector<1x4xf32> to vector<1x4xbf16>
    %c0_9 = arith.constant 0 : index
    %c0_10 = arith.constant 0 : index
    %17 = vector.load %arg4[%c0_9, %c0_10] : memref<4x128xbf16, #tpu.memory_space<vmem>>, vector<4x128xbf16>
    %cst_11 = arith.constant dense<0.000000e+00> : vector<1x128xf32>
    %18 = tpu.matmul %16, %17, %cst_11 {dimension_numbers = #tpu.dot_dimension_numbers<[1], [0], [0], [1], [0, 0, 1, 1], [], []>} : vector<1x4xbf16>, vector<4x128xbf16>, vector<1x128xf32> -> vector<1x128xf32>
    %c0_12 = arith.constant 0 : index
    %c0_13 = arith.constant 0 : index
    %19 = vector.load %arg5[%c0_12, %c0_13] : memref<1x128xf32, #tpu.memory_space<vmem>>, vector<1x128xf32>
    %20 = arith.addf %18, %19 : vector<1x128xf32>
    %cst_14 = arith.constant 0.000000e+00 : f32
    %21 = vector.broadcast %cst_14 : f32 to vector<1x128xf32>
    %22 = arith.maximumf %20, %21 : vector<1x128xf32>
    %c0_15 = arith.constant 0 : index
    %c0_16 = arith.constant 0 : index
    %23 = vector.load %arg8[%c0_15, %c0_16] : memref<1x128xf32, #tpu.memory_space<vmem>>, vector<1x128xf32>
    %24 = arith.truncf %22 : vector<1x128xf32> to vector<1x128xbf16>
    %c0_17 = arith.constant 0 : index
    %c0_18 = arith.constant 0 : index
    %25 = vector.load %arg7[%c0_17, %c0_18] : memref<128x128xbf16, #tpu.memory_space<vmem>>, vector<128x128xbf16>
    %cst_19 = arith.constant dense<0.000000e+00> : vector<1x128xf32>
    %26 = tpu.matmul %24, %25, %cst_19 {dimension_numbers = #tpu.dot_dimension_numbers<[1], [0], [0], [1], [0, 0, 1, 1], [], []>} : vector<1x128xbf16>, vector<128x128xbf16>, vector<1x128xf32> -> vector<1x128xf32>
    %27 = arith.addf %23, %26 : vector<1x128xf32>
    %c0_20 = arith.constant 0 : index
    %c0_21 = arith.constant 0 : index
    %28 = vector.load %arg6[%c0_20, %c0_21] : memref<512x128xbf16, #tpu.memory_space<vmem>>, vector<512x128xbf16>
    %cst_22 = arith.constant dense<0.000000e+00> : vector<256x128xf32>
    %29 = tpu.matmul %9, %28, %cst_22 {dimension_numbers = #tpu.dot_dimension_numbers<[1], [0], [0], [1], [0, 0, 1, 1], [], []>} : vector<256x512xbf16>, vector<512x128xbf16>, vector<256x128xf32> -> vector<256x128xf32>
    %30 = vector.broadcast %27 : vector<1x128xf32> to vector<256x128xf32>
    %31 = arith.addf %29, %30 : vector<256x128xf32>
    %cst_23 = arith.constant 0.000000e+00 : f32
    %32 = vector.broadcast %cst_23 : f32 to vector<256x128xf32>
    %33 = arith.maximumf %31, %32 : vector<256x128xf32>
    %c0_24 = arith.constant 0 : index
    %c0_25 = arith.constant 0 : index
    %c0_26 = arith.constant 0 : index
    %34 = vector.load %arg9[%c0_24, %c0_25, %c0_26] : memref<1x256x128xf32, #tpu.memory_space<vmem>>, vector<1x256x128xf32>
    %35 = vector.shape_cast %34 : vector<1x256x128xf32> to vector<256x128xf32>
    %36 = vector.shape_cast %33 : vector<256x128xf32> to vector<1x256x128xf32>
    tpu.vector_store %arg9[%c0_24, %c0_25, %c0_26], %36 {strides = array<i32>} : memref<1x256x128xf32, #tpu.memory_space<vmem>>, vector<1x256x128xf32>,
    return
  }
  func.func @transform_0(%arg0: i32) -> (i32, i32, i32) {
    %c0_i32 = arith.constant 0 : i32
    %c0_i32_0 = arith.constant 0 : i32
    %c0_i32_1 = arith.constant 0 : i32
    return %arg0, %c0_i32, %c0_i32_0 : i32, i32, i32
  }
  func.func @transform_1(%arg0: i32) -> (i32, i32) {
    %c0_i32 = arith.constant 0 : i32
    %c0_i32_0 = arith.constant 0 : i32
    %c0_i32_1 = arith.constant 0 : i32
    return %c0_i32, %c0_i32_0 : i32, i32
  }
  func.func @transform_2(%arg0: i32) -> (i32, i32) {
    %c0_i32 = arith.constant 0 : i32
    %c0_i32_0 = arith.constant 0 : i32
    %c0_i32_1 = arith.constant 0 : i32
    return %c0_i32, %c0_i32_0 : i32, i32
  }
  func.func @transform_3(%arg0: i32) -> (i32, i32) {
    %c0_i32 = arith.constant 0 : i32
    %c0_i32_0 = arith.constant 0 : i32
    %c0_i32_1 = arith.constant 0 : i32
    return %c0_i32, %c0_i32_0 : i32, i32
  }
  func.func @transform_4(%arg0: i32) -> (i32, i32) {
    %c0_i32 = arith.constant 0 : i32
    %c0_i32_0 = arith.constant 0 : i32
    %c0_i32_1 = arith.constant 0 : i32
    return %c0_i32, %c0_i32_0 : i32, i32
  }
  func.func @transform_5(%arg0: i32) -> (i32, i32) {
    %c0_i32 = arith.constant 0 : i32
    %c0_i32_0 = arith.constant 0 : i32
    %c0_i32_1 = arith.constant 0 : i32
    return %c0_i32, %c0_i32_0 : i32, i32
  }
  func.func @transform_6(%arg0: i32) -> (i32, i32) {
    %c0_i32 = arith.constant 0 : i32
    %c0_i32_0 = arith.constant 0 : i32
    %c0_i32_1 = arith.constant 0 : i32
    return %c0_i32, %c0_i32_0 : i32, i32
  }
  func.func @transform_7(%arg0: i32) -> (i32, i32) {
    %c0_i32 = arith.constant 0 : i32
    %c0_i32_0 = arith.constant 0 : i32
    %c0_i32_1 = arith.constant 0 : i32
    return %c0_i32, %c0_i32_0 : i32, i32
  }
  func.func @transform_8(%arg0: i32) -> (i32, i32, i32) {
    %c0_i32 = arith.constant 0 : i32
    %c0_i32_0 = arith.constant 0 : i32
    %c0_i32_1 = arith.constant 0 : i32
    return %arg0, %c0_i32, %c0_i32_0 : i32, i32, i32
  }
}

</mosaic_0001>

<bundles_post_ra>
// kernel: tpu_custom_call.1
= control target key start
LH: loop header
LB: loop body
LE: loop exit
PB: predicated region body
PF: predicated region fallthrough
CT: control target
= control target key end

     0   :  { %13 = vsyncpa [#allocation3], 0  ;;  %s4035_s0 = inlined_call_operand.vmem [shape: bf16[2,256,112], index: 0, kind: input, shape index: {}]   ;;  %s4036_s1 = inlined_call_operand.vmem [shape: bf16[112,512], index: 1, kind: input, shape index: {}]   ;;  %s4037_s2 = inlined_call_operand.vmem [shape: f32[1,512], index: 2, kind: input, shape index: {}]   ;;  %s4038_s3 = inlined_call_operand.vmem [shape: bf16[4,128], index: 3, kind: input, shape index: {}]   ;;  %s4039_s4 = inlined_call_operand.vmem [shape: f32[1,128], index: 4, kind: input, shape index: {}]   ;;  %s4040_s5 = inlined_call_operand.vmem [shape: bf16[512,128], index: 5, kind: input, shape index: {}]   ;;  %s4041_s6 = inlined_call_operand.hbm [shape: bf16[128,128], index: 6, kind: input, shape index: {}]   ;;  %s4042_s7 = inlined_call_operand.vmem [shape: f32[1,128], index: 7, kind: input, shape index: {}]   ;;  %s4043_s8 = inlined_call_operand.hbm [shape: f32[2,256,128], index: 8, kind: output, shape index: {}]  }
   0x1   :  { %14 = vsyncpa [#allocation4], 0 }
   0x2   :  { %16 = vsyncpa [#allocation4 + $0x1], 0  ;;  %s2958_s27 = smov 0   ;;  %s2960_s28 = smov 0  }
   0x3   :  { %s2962_s29 = smov 0   ;;  %s2964_s30 = smov 0  }
   0x4 LB: > { %s2979_s9 = sadd.s32 4294967295, %s2902_s30   ;;  %s2247_s10 = sadd.s32 4294967294, %s2902_s30   ;;  %s2902_s30 = sphi %s2964_s30, %s4051_s30   ;;  %s2898_s29 = sphi %s2962_s29, %s4050_s29   ;;  %s2894_s28 = sphi %s2960_s28, %s4049_s28   ;;  %s2890_s27 = sphi %s2958_s27, %s4048_s27  }
   0x5   : > { %s2983_s11 = sadd.s32 1, %s2902_s30   ;;  %s202_s12 = sadd.s32 1, %s2898_s29 }
   0x6   : > { %s199_s13 = ssub.s32 %s2902_s30, %s2983_s11  ;;  %p212_p0 = scmp.ne.s32.totalorder %s2898_s29, %s2894_s28 }
   0x7   : > { %p200_p1 = scmp.eq.s32.totalorder %s199_s13, 0  ;;  %p213_p2 = scmp.eq.s32.totalorder %s2979_s9, 1 }
   0x8   : > { %p218_p3 = scmp.ne.s32.totalorder %s2894_s28, %s2890_s27  ;;  %p219_p4 = scmp.eq.s32.totalorder %s2247_s10, 1 }
   0x9   : > { %s2994_s14 = scalar_select %p200_p1, %s2898_s29, %s202_s12  }
   0xa   : > { %p2996_p5 = por %p213_p2, %p212_p0  ;;  %p3000_p6 = por %p219_p4, %p218_p3 }
   0xb   : > { %p2248_p7 = scmp.ge.s32.totalorder %s2902_s30, 1  ;;  %p226_p8 = scmp.lt.s32.totalorder %s2902_s30, 3 }
   0xc   : > { %s4045_s16 = scalar_select %p3000_p6, 1, 0 }
   0xd   : > { %p2655_p9 = scmp.eq.s32.totalorder %s2979_s9, 0  ;;  %p3007_p10 = pnand %p2248_p7, %p226_p8 }
   0xe   : > { %s2904_s18 = smov [#allocation2]  }
   0xf   : > { %s253_s19 = sshll.u32 %s2904_s18, 4  ;;  %p2647_p11 = pneg %p3007_p10  ;;  %s254_s19 = int_to_ptr.vmem [resolvable:$true] %s253_s19 }
  0x10   : > { %s2823_s20 = scalar_lea.vmem %s254_s19, 1024  ;;  %p2831_p3 = scmp.lt.s32.totalorder %s254_s19, %s254_s19 }
  0x11   : > { %p2648_p12 = pnand %p2655_p9, %p2647_p11  ;;  %p2824_p0 = scmp.ne.s32.totalorder %s254_s19, %s2823_s20 }
  0x12   : > { %p2832_p4 = scmp.lt.s32.totalorder %s2823_s20, %s2823_s20 }
  0x13   : > { %p2814_p13 = pneg %p2648_p12 }
  0x14   : > { %p2833_p6 = por %p2832_p4, %p2831_p3 }
  0x15   : > { %p2826_p1 = pnand %p2824_p0, %p2814_p13 }
  0x17   : > { %p2827_p2 = pneg %p2826_p1 }
  0x19   : > { %p2834_p7 = pnand %p2833_p6, %p2827_p2 }
  0x1b   : > { %2837 = shalt.err (!%p2834_p7)
}
  0x1c   : > { %s2905_s21 = smov 64   ;;  %s2906_s22 = smov 4  }
  0x1d   : > { %2650 = dma.hbm_to_vmem [thread:$0]  (!%p2648_p12), %s4041_s6, 1024, %s254_s19, [#allocation3], %s2905_s21, %s2905_s21, %s2906_s22  }
  0x1e   : > { %280 = sbr.rel (%p3007_p10) target bundleno = 764 (0x2fc), region = 52 }
  0x23   : > { %2881 = dma.done.wait (%p2655_p9), [#allocation3], 1024  }
  0x24   : > { %2883 = vsyncadd (%p2655_p9), [#allocation3], 4294966272  ;;  %v2907_v0 = vmov 0   ;;  %p314_p6 = scmp.lt.s32.totalorder %s2979_s9, 1  ;;  %v2698_v1 = vld [vmem:[%s4036_s1 + $0xc4] ss:$16 sps:$4 sm:$0xff]  }
  0x25   : > { %703 = vmatprep.mubr.bf16.mxu0 %v2907_v0  ;;  %896 = vmatprep.mubr.bf16.mxu1 %v2907_v0  ;;  %v2700_v2 = vld [vmem:[%s4036_s1 + $0xc0] ss:$16 sps:$4 sm:$0xff]   ;;  %v2701_v3 = vld [vmem:[%s4036_s1 + $0xa4] ss:$16 sps:$4 sm:$0xff]   ;;  %vm1281_vm0 = vcmask 31744   ;;  %vm1359_vm1 = vcmask 1041408  }
  0x26   : > { %s315_s25 = scalar_select %p314_p6, %s2979_s9, 1  ;;  %673 = vmatprep.subr.bf16.mxu0 %v2698_v1  ;;  %v2703_v4 = vld [vmem:[%s4036_s1 + $0xa0] ss:$16 sps:$4 sm:$0xff]   ;;  %v2704_v5 = vld [vmem:[%s4036_s1 + $0x84] ss:$16 sps:$4 sm:$0xff]   ;;  %vm622_vm2 = vcmask 916480  }
  0x27   : > { %674 = vmatpush1.bf16.msra.mxu0 %v2700_v2  ;;  %v2706_v6 = vld [vmem:[%s4036_s1 + $0x80] ss:$16 sps:$4 sm:$0xff]   ;;  %v2707_v7 = vld [vmem:[%s4036_s1 + $0x64] ss:$16 sps:$4 sm:$0xff]   ;;  %v2734_v28 = vld [vmem:[%s4036_s1 + $0xcc] ss:$16 sps:$4 sm:$0xff]  }
  0x28   : > { %s2378_s21 = sshll.u32 %s315_s25, 7  ;;  %675 = vmatprep.subr.bf16.mxu0 %v2701_v3  ;;  %v2709_v12 = vld [vmem:[%s4036_s1 + $0x60] ss:$16 sps:$4 sm:$0xff]   ;;  %v2710_v16 = vld [vmem:[%s4036_s1 + $0x44] ss:$16 sps:$4 sm:$0xff]   ;;  %866 = vmatprep.subr.bf16.mxu1 %v2734_v28  ;;  %v2908_v53 = vmov 0.0  }
  0x29   : > { %s3046_s10 = scalar_lea.vmem %s4035_s0, %s2378_s21  ;;  %v2712_v22 = vld [vmem:[%s4036_s1 + $0x40] ss:$16 sps:$4 sm:$0xff]   ;;  %v2713_v23 = vld [vmem:[%s4036_s1 + $0x24] ss:$16 sps:$4 sm:$0xff]   ;;  %v2737_v36 = vld [vmem:[%s4036_s1 + $0xc8] ss:$16 sps:$4 sm:$0xff]  }
  0x2a   : > { %v3055_v8 = vld [vmem:[%s3046_s10] sm:$0xff]   ;;  %v3060_v11 = vld [vmem:[%s3046_s10 + $0x8] sm:$0xff]   ;;  %v3068_v15 = vld [vmem:[%s3046_s10 + $0x10] sm:$0xff]   ;;  %867 = vmatpush1.bf16.msra.mxu1 %v2737_v36  ;;  %vm2909_vm3 = vmmov 0   ;;  %s311_s18 = sand.u32 1, %s2894_s28   ;;  %s2379_s21 = sshll.u32 %s2979_s9, 12 }
  0x2b   : > { %676 = vmatpush1.bf16.msra.mxu0 %v2703_v4  ;;  %v1249_v9 = vunpack.c.l.bf16 %v3055_v8  ;;  %v1250_v10 = vunpack.c.h.bf16 %v3055_v8  ;;  %v1251_v13 = vunpack.c.l.bf16 %v3060_v11  ;;  %v1252_v14 = vunpack.c.h.bf16 %v3060_v11  ;;  %v3086_v27 = vld [vmem:[%s3046_s10 + $0x18] sm:$0xff]   ;;  %v2715_v31 = vld [vmem:[%s4036_s1 + $0x20] ss:$16 sps:$4 sm:$0xff]   ;;  %v2716_v37 = vld [vmem:[%s4036_s1 + $0x4] ss:$16 sps:$4 sm:$0xff]   ;;  %s2253_s19 = sshll.u32 %s311_s18, 8  ;;  %s3988_s26 = scalar_lea.hbm %s4043_s8, %s2379_s21 }
  0x2c   : > { %677 = vmatprep.subr.bf16.mxu0 %v2704_v5  ;;  %v1253_v19 = vunpack.c.l.bf16 %v3068_v15  ;;  %v1254_v25 = vunpack.c.h.bf16 %v3068_v15  ;;  %v1255_v30 = vunpack.c.l.bf16 %v3086_v27  ;;  %v1256_v35 = vunpack.c.h.bf16 %v3086_v27  ;;  %v2718_v39 = vld [vmem:[%s4036_s1] ss:$16 sps:$4 sm:$0xff]   ;;  %v2738_v42 = vld [vmem:[%s4036_s1 + $0xac] ss:$16 sps:$4 sm:$0xff]   ;;  %v2740_v43 = vld [vmem:[%s4036_s1 + $0xa8] ss:$16 sps:$4 sm:$0xff]  }
  0x2d   : > { %v1282_v17 = vsel %vm1281_vm0, %v1249_v9, 0.0  ;;  %v1283_v18 = vsel %vm1281_vm0, %v1250_v10, 0.0  ;;  %v1285_v21 = vsel %vm1281_vm0, %v1251_v13, 0.0  ;;  %v1287_v24 = vsel %vm1281_vm0, %v1252_v14, 0.0  ;;  %v3109_v41 = vld [vmem:[%s3046_s10 + $0x20] sm:$0xff]   ;;  %868 = vmatprep.subr.bf16.mxu1 %v2738_v42  ;;  %v3133_v55 = vld [vmem:[%s3046_s10 + $0x28] sm:$0xff]  }
  0x2e   : > { %v1284_v20 = vadd.f32 %v1283_v18, %v1282_v17  ;;  %v1289_v29 = vsel %vm1281_vm0, %v1253_v19, 0.0  ;;  %v1291_v33 = vsel %vm1281_vm0, %v1254_v25, 0.0  ;;  %v1293_v38 = vsel %vm1281_vm0, %v1255_v30, 0.0  ;;  %v1354_v44 = vld [vmem:[%s4038_s3] sm:$0x3]  ;;  %869 = vmatpush1.bf16.msra.mxu1 %v2740_v43  ;;  %v2756_v62 = vld [vmem:[%s4040_s5 + $0x78] sm:$0xff]  }
  0x2f   : > { %678 = vmatpush1.bf16.msra.mxu0 %v2706_v6  ;;  %v1295_v46 = vsel %vm1281_vm0, %v1256_v35, 0.0  ;;  %v1257_v47 = vunpack.c.l.bf16 %v3109_v41  ;;  %v2741_v48 = vld [vmem:[%s4036_s1 + $0x8c] ss:$16 sps:$4 sm:$0xff]   ;;  %v2743_v49 = vld [vmem:[%s4036_s1 + $0x88] ss:$16 sps:$4 sm:$0xff]   ;;  %v1258_v51 = vunpack.c.h.bf16 %v3109_v41  ;;  %v1361_v54 = vsel %vm1359_vm1, %v1354_v44, 0 }
  0x30   : > { %679 = vmatprep.subr.bf16.mxu0 %v2707_v7  ;;  %v1286_v26 = vadd.f32 %v1285_v21, %v1284_v20  ;;  %870 = vmatprep.subr.bf16.mxu1 %v2741_v48  ;;  %v1259_v57 = vunpack.c.l.bf16 %v3133_v55  ;;  %v2744_v58 = vld [vmem:[%s4036_s1 + $0x6c] ss:$16 sps:$4 sm:$0xff]   ;;  %v2746_v59 = vld [vmem:[%s4036_s1 + $0x68] ss:$16 sps:$4 sm:$0xff]   ;;  %v1260_v4 = vunpack.c.h.bf16 %v3133_v55  ;;  %v3164_v6 = vld [vmem:[%s3046_s10 + $0x30] sm:$0xff]   ;;  %s3839_s20 = scalar_lea.vmem [#allocation5], %s2253_s19 }
  0x31   : > { %v1297_v52 = vsel %vm1281_vm0, %v1257_v47, 0.0  ;;  %v1299_v60 = vsel %vm1281_vm0, %v1258_v51, 0.0  ;;  %v2747_v61 = vld [vmem:[%s4036_s1 + $0x4c] ss:$16 sps:$4 sm:$0xff]   ;;  %v2749_v63 = vld [vmem:[%s4036_s1 + $0x48] ss:$16 sps:$4 sm:$0xff]  }
  0x32   : > { %v1288_v32 = vadd.f32 %v1287_v24, %v1286_v26  ;;  %871 = vmatpush1.bf16.msra.mxu1 %v2743_v49  ;;  %v1301_v2 = vsel %vm1281_vm0, %v1259_v57, 0.0  ;;  %v2750_v3 = vld [vmem:[%s4036_s1 + $0x2c] ss:$16 sps:$4 sm:$0xff]   ;;  %v2752_v5 = vld [vmem:[%s4036_s1 + $0x28] ss:$16 sps:$4 sm:$0xff]   ;;  %v1303_v10 = vsel %vm1281_vm0, %v1260_v4, 0.0 }
  0x33   : > { %680 = vmatpush1.bf16.msra.mxu0 %v2709_v12  ;;  %872 = vmatprep.subr.bf16.mxu1 %v2744_v58  ;;  %v2753_v7 = vld [vmem:[%s4036_s1 + $0xc] ss:$16 sps:$4 sm:$0xff]   ;;  %v1261_v12 = vunpack.c.l.bf16 %v3164_v6  ;;  %v2755_v13 = vld [vmem:[%s4036_s1 + $0x8] ss:$16 sps:$4 sm:$0xff]   ;;  %v3195_v26 = vld [vmem:[%s3046_s10 + $0x40] sm:$0xff]   ;;  %s2173_s22 = sshll.u32 %s3839_s20, 4  ;;  %s3990_s22 = int_to_ptr.vmem [resolvable:$true] %s2173_s22 }
  0x34   : > { %681 = vmatprep.subr.bf16.mxu0 %v2710_v16  ;;  %v1290_v34 = vadd.f32 %v1289_v29, %v1288_v32  ;;  %v1262_v16 = vunpack.c.h.bf16 %v3164_v6  ;;  %v3180_v18 = vld [vmem:[%s3046_s10 + $0x38] sm:$0xff]   ;;  %v1265_v29 = vunpack.c.l.bf16 %v3195_v26  ;;  %v1266_v30 = vunpack.c.h.bf16 %v3195_v26  ;;  %v3246_v51 = vld [vmem:[%s3046_s10 + $0x60] sm:$0xff]   ;;  %s3995_s12 = scalar_lea.sflag [#allocation4], %s311_s18  ;;  %s2838_s13 = scalar_lea.vmem %s3990_s22, 4096 }
  0x35   : > { %v1305_v17 = vsel %vm1281_vm0, %v1261_v12, 0.0  ;;  %v1263_v21 = vunpack.c.l.bf16 %v3180_v18  ;;  %v1274_v57 = vunpack.c.h.bf16 %v3246_v51  ;;  %v3285_v12 = vld [vmem:[%s3046_s10 + $0x78] sm:$0xff]   ;;  %p2839_p8 = scmp.ne.s32.totalorder %s3990_s22, %s2838_s13  ;;  %s2910_s9 = smov [#allocation5]  }
  0x36   : > { %v1292_v40 = vadd.f32 %v1291_v33, %v1290_v34  ;;  %873 = vmatpush1.bf16.msra.mxu1 %v2746_v59  ;;  %v1307_v20 = vsel %vm1281_vm0, %v1262_v16, 0.0  ;;  %v3209_v33 = vld [vmem:[%s3046_s10 + $0x48] sm:$0xff]   ;;  %v1315_v34 = vsel %vm1281_vm0, %v1266_v30, 0.0  ;;  %v1279_v16 = vunpack.c.l.bf16 %v3285_v12 }
  0x37   : > { %682 = vmatpush1.bf16.msra.mxu0 %v2712_v22  ;;  %874 = vmatprep.subr.bf16.mxu1 %v2747_v61  ;;  %v1264_v22 = vunpack.c.h.bf16 %v3180_v18  ;;  %v1309_v24 = vsel %vm1281_vm0, %v1263_v21, 0.0  ;;  %v1268_v36 = vunpack.c.h.bf16 %v3209_v33  ;;  %v3259_v59 = vld [vmem:[%s3046_s10 + $0x68] sm:$0xff]   ;;  %v1331_v61 = vsel %vm1281_vm0, %v1274_v57, 0.0  ;;  %p2840_p9 = pnand %p2839_p8, %p2996_p5 }
  0x38   : > { %683 = vmatprep.subr.bf16.mxu0 %v2713_v23  ;;  %v1294_v45 = vadd.f32 %v1293_v38, %v1292_v40 }
  0x39   : > { %v1311_v25 = vsel %vm1281_vm0, %v1264_v22, 0.0  ;;  %v1319_v40 = vsel %vm1281_vm0, %v1268_v36, 0.0  ;;  %v2773_v22 = vld [vmem:[#allocation2 + $0x30] sm:$0xff]   ;;  %v2760_v36 = vld [vmem:[%s4040_s5 + $0x68] sm:$0xff]   ;;  %p2841_p10 = pneg %p2840_p9 }
  0x3a   : > { %v1296_v50 = vadd.f32 %v1295_v46, %v1294_v45  ;;  %875 = vmatpush1.bf16.msra.mxu1 %v2749_v63  ;;  %v3235_v46 = vld [vmem:[%s3046_s10 + $0x58] sm:$0xff]   ;;  %v1276_v63 = vunpack.c.h.bf16 %v3259_v59 }
  0x3b   : > { %684 = vmatpush1.bf16.msra.mxu0 %v2715_v31  ;;  %876 = vmatprep.subr.bf16.mxu1 %v2750_v3  ;;  %v1313_v31 = vsel %vm1281_vm0, %v1265_v29, 0.0  ;;  %v1272_v49 = vunpack.c.h.bf16 %v3235_v46 }
  0x3c   : > { %685 = vmatprep.subr.bf16.mxu0 %v2716_v37  ;;  %v1298_v56 = vadd.f32 %v1297_v52, %v1296_v50  ;;  %v1335_v4 = vsel %vm1281_vm0, %v1276_v63, 0.0 }
  0x3e   : > { %v1300_v1 = vadd.f32 %v1299_v60, %v1298_v56  ;;  %877 = vmatpush1.bf16.msra.mxu1 %v2752_v5 }
  0x3f   : > { %686 = vmatpush1.bf16.msra.mxu0 %v2718_v39  ;;  %878 = vmatprep.subr.bf16.mxu1 %v2753_v7  ;;  %v3222_v39 = vld [vmem:[%s3046_s10 + $0x50] sm:$0xff]  }
  0x40   : > { %2615 = vmatprep.subr.bf16.mxu0 %v2908_v53  ;;  %v1302_v9 = vadd.f32 %v1301_v2, %v1300_v1  ;;  %v1270_v43 = vunpack.c.h.bf16 %v3222_v39  ;;  %v3272_v2 = vld [vmem:[%s3046_s10 + $0x70] sm:$0xff]   ;;  %s2842_s10 = sshll.u32 %s2910_s9, 4  ;;  %s2843_s10 = int_to_ptr.vmem [resolvable:$false] %s2842_s10 }
  0x41   : > { %v1277_v5 = vunpack.c.l.bf16 %v3272_v2  ;;  %s2844_s25 = scalar_lea.vmem %s2843_s10, 8192  ;;  %p2845_p11 = scmp.lt.s32.totalorder %s3990_s22, %s2843_s10 }
  0x42   : > { %2300 = vmatmul.mubr.msk.bf16.vlgmr.msra.gmra.mxu0 %vm622_vm2, %v3055_v8  ;;  %v1304_v14 = vadd.f32 %v1303_v10, %v1302_v9  ;;  %879 = vmatpush1.bf16.msra.mxu1 %v2755_v13  ;;  %v1323_v47 = vsel %vm1281_vm0, %v1270_v43, 0.0  ;;  %v1278_v9 = vunpack.c.h.bf16 %v3272_v2  ;;  %v2767_v43 = vld [vmem:[%s4040_s5 + $0x10] sm:$0xff]   ;;  %p2846_p12 = scmp.lt.s32.totalorder %s2844_s25, %s2838_s13 }
  0x43   : > { %2616 = vmatpush3.bf16.msra.mxu0 %v1361_v54  ;;  %713 = vmatprep.mubr.bf16.mxu0 %v2907_v0  ;;  %v1327_v54 = vsel %vm1281_vm0, %v1272_v49, 0.0  ;;  %v1337_v10 = vsel %vm1281_vm0, %v1277_v5, 0.0  ;;  %v382_v49 = vlaneseq }
  0x44   : > { %2391 = vmatprep.subr.bf16.mxu0 %v2756_v62  ;;  %v1306_v19 = vadd.f32 %v1305_v17, %v1304_v14  ;;  %2621 = vmatprep.subr.bf16.mxu1 %v2908_v53  ;;  %v1339_v14 = vsel %vm1281_vm0, %v1278_v9, 0.0  ;;  %p2847_p13 = por %p2846_p12, %p2845_p11 }
  0x45   : > { %2316 = vmatmul.mubr.msk.bf16.vlgmr.msra.gmra.mxu1 %vm622_vm2, %v3055_v8 }
  0x46   : > { %906 = vmatprep.mubr.bf16.mxu1 %v2907_v0  ;;  %v1308_v23 = vadd.f32 %v1307_v20, %v1306_v19  ;;  %v1341_v19 = vsel %vm1281_vm0, %v1279_v16, 0.0  ;;  %p2848_p0 = pnand %p2847_p13, %p2841_p10 }
  0x48   : > { %v1310_v28 = vadd.f32 %v1309_v24, %v1308_v23 }
  0x4a   : > { %2301 = vmatmul.mubr.msk.bf16.gmra.mxu0 %vm622_vm2, %v3060_v11  ;;  %v1312_v8 = vadd.f32 %v1311_v25, %v1310_v28  ;;  %v2774_v28 = vld [vmem:[#allocation2 + $0x28] sm:$0xff]  }
  0x4b   : > { %723 = vmatprep.mubr.bf16.mxu0 %v2907_v0 }
  0x4c   : > { %v1314_v32 = vadd.f32 %v1313_v31, %v1312_v8 }
  0x4d   : > { %2317 = vmatmul.mubr.msk.bf16.gmra.mxu1 %vm622_vm2, %v3060_v11  ;;  %v1267_v11 = vunpack.c.l.bf16 %v3209_v33 }
  0x4e   : > { %916 = vmatprep.mubr.bf16.mxu1 %v2907_v0  ;;  %v1316_v35 = vadd.f32 %v1315_v34, %v1314_v32  ;;  %v2775_v32 = vld [vmem:[#allocation2 + $0x20] sm:$0xff]   ;;  %v2757_v34 = vld [vmem:[%s4040_s5 + $0x38] sm:$0xff]  }
  0x4f   : > { %v1317_v37 = vsel %vm1281_vm0, %v1267_v11, 0.0  ;;  %v2758_v11 = vld [vmem:[%s4040_s5 + $0x70] sm:$0xff]  }
  0x50   : > { %v1318_v38 = vadd.f32 %v1317_v37, %v1316_v35  ;;  %v2759_v35 = vld [vmem:[%s4040_s5 + $0x30] sm:$0xff]   ;;  %v2761_v37 = vld [vmem:[%s4040_s5 + $0x28] sm:$0xff]  }
  0x52   : > { %2302 = vmatmul.mubr.msk.bf16.gmra.mxu0 %vm622_vm2, %v3068_v15  ;;  %v1320_v42 = vadd.f32 %v1319_v40, %v1318_v38  ;;  %v2762_v38 = vld [vmem:[%s4040_s5 + $0x60] sm:$0xff]   ;;  %v2776_v40 = vld [vmem:[#allocation2 + $0x18] sm:$0xff]  }
  0x53   : > { %733 = vmatprep.mubr.bf16.mxu0 %v2907_v0 }
  0x55   : > { %2318 = vmatmul.mubr.msk.bf16.gmra.mxu1 %vm622_vm2, %v3068_v15  ;;  %v1269_v15 = vunpack.c.l.bf16 %v3222_v39 }
  0x56   : > { %926 = vmatprep.mubr.bf16.mxu1 %v2907_v0 }
  0x57   : > { %v1321_v44 = vsel %vm1281_vm0, %v1269_v15, 0.0  ;;  %v2765_v15 = vld [vmem:[%s4040_s5 + $0x18] sm:$0xff]  }
  0x58   : > { %v1322_v45 = vadd.f32 %v1321_v44, %v1320_v42  ;;  %v2766_v42 = vld [vmem:[%s4040_s5 + $0x50] sm:$0xff]   ;;  %v2768_v44 = vld [vmem:[%s4040_s5 + $0x48] sm:$0xff]  }
  0x5a   : > { %2303 = vmatmul.mubr.msk.bf16.gmra.mxu0 %vm622_vm2, %v3086_v27  ;;  %v1324_v48 = vadd.f32 %v1323_v47, %v1322_v45  ;;  %v2769_v45 = vld [vmem:[%s4040_s5 + $0x8] sm:$0xff]   ;;  %v2772_v47 = vld [vmem:[%s4040_s5] sm:$0xff]  }
  0x5b   : > { %743 = vmatprep.mubr.bf16.mxu0 %v2907_v0 }
  0x5d   : > { %2319 = vmatmul.mubr.msk.bf16.gmra.mxu1 %vm622_vm2, %v3086_v27  ;;  %v1271_v27 = vunpack.c.l.bf16 %v3235_v46 }
  0x5e   : > { %936 = vmatprep.mubr.bf16.mxu1 %v2907_v0 }
  0x5f   : > { %v1325_v50 = vsel %vm1281_vm0, %v1271_v27, 0.0  ;;  %v2777_v27 = vld [vmem:[#allocation2 + $0x10] sm:$0xff]  }
  0x60   : > { %v1326_v52 = vadd.f32 %v1325_v50, %v1324_v48  ;;  %v2778_v48 = vld [vmem:[#allocation2 + $0x8] sm:$0xff]   ;;  %v3389_v50 = vshrl.u32 %v382_v49, 7 }
  0x62   : > { %2304 = vmatmul.mubr.msk.bf16.gmra.mxu0 %vm622_vm2, %v3109_v41  ;;  %v1328_v56 = vadd.f32 %v1327_v54, %v1326_v52  ;;  %v388_v52 = vsub.s32 1, %v3389_v50  ;;  %v384_v54 = vsub.s32 0, %v3389_v50 }
  0x63   : > { %753 = vmatprep.mubr.bf16.mxu0 %v2907_v0 }
  0x65   : > { %2320 = vmatmul.mubr.msk.bf16.gmra.mxu1 %vm622_vm2, %v3109_v41  ;;  %v1273_v41 = vunpack.c.l.bf16 %v3246_v51 }
  0x66   : > { %946 = vmatprep.mubr.bf16.mxu1 %v2907_v0 }
  0x67   : > { %v1329_v58 = vsel %vm1281_vm0, %v1273_v41, 0.0  ;;  %v3396_v41 = vld [vmem:[%s4037_s2] sm:$0xf] }
  0x68   : > { %v1330_v60 = vadd.f32 %v1329_v58, %v1328_v56  ;;  %v3399_v57 = vrot.slane %v3396_v41, %v388_v52 }
  0x6a   : > { %2305 = vmatmul.mubr.msk.bf16.gmra.mxu0 %vm622_vm2, %v3133_v55  ;;  %v1332_v62 = vadd.f32 %v1331_v61, %v1330_v60  ;;  %v2780_v60 = vld [vmem:[%s4040_s5 + $0xf8] sm:$0xff]  }
  0x6b   : > { %763 = vmatprep.mubr.bf16.mxu0 %v2907_v0 }
  0x6d   : > { %2321 = vmatmul.mubr.msk.bf16.gmra.mxu1 %vm622_vm2, %v3133_v55  ;;  %v1275_v55 = vunpack.c.l.bf16 %v3259_v59 }
  0x6e   : > { %956 = vmatprep.mubr.bf16.mxu1 %v2907_v0 }
  0x6f   : > { %v1333_v1 = vsel %vm1281_vm0, %v1275_v55, 0.0 }
  0x70   : > { %v1334_v3 = vadd.f32 %v1333_v1, %v1332_v62 }
  0x72   : > { %2306 = vmatmul.mubr.msk.bf16.gmra.mxu0 %vm622_vm2, %v3164_v6  ;;  %v1336_v7 = vadd.f32 %v1335_v4, %v1334_v3 }
  0x73   : > { %773 = vmatprep.mubr.bf16.mxu0 %v2907_v0 }
  0x74   : > { %v1338_v13 = vadd.f32 %v1337_v10, %v1336_v7 }
  0x75   : > { %2322 = vmatmul.mubr.msk.bf16.gmra.mxu1 %vm622_vm2, %v3164_v6  ;;  %v2770_v6 = vld [vmem:[#allocation2 + $0x38] sm:$0xff]  }
  0x76   : > { %966 = vmatprep.mubr.bf16.mxu1 %v2907_v0  ;;  %2622 = vmatpush3.bf16.msra.mxu1 %v2770_v6  ;;  %v1340_v17 = vadd.f32 %v1339_v14, %v1338_v13 }
  0x77   : > { %2623 = vmatprep.subr.bf16.mxu1 %v2908_v53 }
  0x78   : > { %v1342_v20 = vadd.f32 %v1341_v19, %v1340_v17 }
  0x7a   : > { %2307 = vmatmul.mubr.msk.bf16.gmra.mxu0 %vm622_vm2, %v3180_v18  ;;  %2624 = vmatpush3.bf16.msra.mxu1 %v2773_v22 }
  0x7b   : > { %783 = vmatprep.mubr.bf16.mxu0 %v2907_v0  ;;  %2625 = vmatprep.subr.bf16.mxu1 %v2908_v53 }
  0x7d   : > { %2323 = vmatmul.mubr.msk.bf16.gmra.mxu1 %vm622_vm2, %v3180_v18  ;;  %v1280_v18 = vunpack.c.h.bf16 %v3285_v12 }
  0x7e   : > { %976 = vmatprep.mubr.bf16.mxu1 %v2907_v0  ;;  %2626 = vmatpush3.bf16.msra.mxu1 %v2774_v28 }
  0x7f   : > { %v1343_v21 = vsel %vm1281_vm0, %v1280_v18, 0.0  ;;  %2627 = vmatprep.subr.bf16.mxu1 %v2908_v53 }
  0x80   : > { %v1344_v23 = vadd.f32 %v1343_v21, %v1342_v20 }
  0x82   : > { %2308 = vmatmul.mubr.msk.bf16.gmra.mxu0 %vm622_vm2, %v3195_v26  ;;  %v1345_v24 = vrot.slane %v1344_v23, 4  ;;  %2628 = vmatpush3.bf16.msra.mxu1 %v2775_v32 }
  0x83   : > { %793 = vmatprep.mubr.bf16.mxu0 %v2907_v0  ;;  %2629 = vmatprep.subr.bf16.mxu1 %v2908_v53 }
  0x84   : > { %v1346_v25 = vadd.f32 %v1345_v24, %v1344_v23 }
  0x85   : > { %2324 = vmatmul.mubr.msk.bf16.gmra.mxu1 %vm622_vm2, %v3195_v26 }
  0x86   : > { %986 = vmatprep.mubr.bf16.mxu1 %v2907_v0  ;;  %v1347_v26 = vrot.slane %v1346_v25, 2  ;;  %2630 = vmatpush3.bf16.msra.mxu1 %v2776_v40 }
  0x87   : > { %2631 = vmatprep.subr.bf16.mxu1 %v2908_v53 }
  0x88   : > { %v1348_v29 = vadd.f32 %v1347_v26, %v1346_v25 }
  0x8a   : > { %2309 = vmatmul.mubr.msk.bf16.gmra.mxu0 %vm622_vm2, %v3209_v33  ;;  %v1349_v8 = vrot.slane %v1348_v29, 1  ;;  %2632 = vmatpush3.bf16.msra.mxu1 %v2777_v27 }
  0x8b   : > { %803 = vmatprep.mubr.bf16.mxu0 %v2907_v0  ;;  %2633 = vmatprep.subr.bf16.mxu1 %v2908_v53 }
  0x8c   : > { %v1350_v30 = vadd.f32 %v1349_v8, %v1348_v29 }
  0x8d   : > { %2325 = vmatmul.mubr.msk.bf16.gmra.mxu1 %vm622_vm2, %v3209_v33 }
  0x8e   : > { %996 = vmatprep.mubr.bf16.mxu1 %v2907_v0  ;;  %v1352_v31 = vmul.f32 0.00390625, %v1350_v30  ;;  %2634 = vmatpush3.bf16.msra.mxu1 %v2778_v48 }
  0x8f   : > { %2635 = vmatprep.subr.bf16.mxu1 %v2908_v53 }
  0x90   : > { %v1353_v33 = vpack.c.bf16 %v1352_v31, %v1352_v31 }
  0x92   : > { %2310 = vmatmul.mubr.msk.bf16.gmra.mxu0 %vm622_vm2, %v3222_v39 }
  0x93   : > { %813 = vmatprep.mubr.bf16.mxu0 %v2907_v0 }
  0x95   : > { %2326 = vmatmul.mubr.msk.bf16.gmra.mxu1 %vm622_vm2, %v3222_v39  ;;  %v2763_v39 = vld [vmem:[%s4040_s5 + $0x20] sm:$0xff]  }
  0x96   : > { %1006 = vmatprep.mubr.bf16.mxu1 %v2907_v0 }
  0x9a   : > { %2311 = vmatmul.mubr.msk.bf16.gmra.mxu0 %vm622_vm2, %v3235_v46 }
  0x9b   : > { %823 = vmatprep.mubr.bf16.mxu0 %v2907_v0 }
  0x9d   : > { %2327 = vmatmul.mubr.msk.bf16.gmra.mxu1 %vm622_vm2, %v3235_v46  ;;  %v2771_v46 = vld [vmem:[%s4040_s5 + $0x40] sm:$0xff]  }
  0x9e   : > { %1016 = vmatprep.mubr.bf16.mxu1 %v2907_v0 }
  0xa2   : > { %2312 = vmatmul.mubr.msk.bf16.gmra.mxu0 %vm622_vm2, %v3246_v51 }
  0xa3   : > { %833 = vmatprep.mubr.bf16.mxu0 %v2907_v0 }
  0xa5   : > { %2328 = vmatmul.mubr.msk.bf16.gmra.mxu1 %vm622_vm2, %v3246_v51  ;;  %v2779_v51 = vld [vmem:[#allocation2] sm:$0xff]  }
  0xa6   : > { %1026 = vmatprep.mubr.bf16.mxu1 %v2907_v0  ;;  %2636 = vmatpush3.bf16.msra.mxu1 %v2779_v51 }
  0xa7   : > { %2503 = vmatprep.subr.bf16.mxu1 %v2780_v60 }
  0xaa   : > { %2313 = vmatmul.mubr.msk.bf16.gmra.mxu0 %vm622_vm2, %v3259_v59 }
  0xab   : > { %843 = vmatprep.mubr.bf16.mxu0 %v2907_v0 }
  0xad   : > { %2329 = vmatmul.mubr.msk.bf16.gmra.mxu1 %vm622_vm2, %v3259_v59 }
  0xae   : > { %1036 = vmatprep.mubr.bf16.mxu1 %v2907_v0 }
  0xb2   : > { %2314 = vmatmul.mubr.msk.bf16.gmra.mxu0 %vm622_vm2, %v3272_v2 }
  0xb3   : > { %853 = vmatprep.mubr.bf16.mxu0 %v2907_v0 }
  0xb5   : > { %2330 = vmatmul.mubr.msk.bf16.gmra.mxu1 %vm622_vm2, %v3272_v2 }
  0xb6   : > { %1046 = vmatprep.mubr.bf16.mxu1 %v2907_v0  ;;  %v2764_v0 = vld [vmem:[%s4040_s5 + $0x58] sm:$0xff]  }
  0xba   : > { %2315 = vmatmul.mubr.msk.bf16.gmra.mxu0 %vm622_vm2, %v3285_v12 }
  0xbb   : > { %2617 = vmatprep.mubr.msk.bf16.mxu0 %vm2909_vm3, %v2908_v53 }
  0xbd   : > { %2331 = vmatmul.mubr.msk.bf16.gmra.mxu1 %vm622_vm2, %v3285_v12 }
  0xbe   : > { %2637 = vmatprep.mubr.msk.bf16.mxu1 %vm2909_vm3, %v2908_v53  ;;  %v3404_v53 = vrot.slane %v3396_v41, %v384_v54 }
  0xc2   : > { %2618 = vmatmul.mubr.msk.bf16.vlgmr.msra.gmra.mxu0 %vm1281_vm0, %v1353_v33 }
  0xc3   : > { %2392 = vmatpush3.bf16.msra.mxu0 %v2757_v34 }
  0xc4   : > { %2393 = vmatprep.subr.bf16.mxu0 %v2758_v11 }
  0xc7   : > { %2394 = vmatpush3.bf16.msra.mxu0 %v2759_v35 }
  0xc8   : > { %2395 = vmatprep.subr.bf16.mxu0 %v2760_v36 }
  0xcb   : > { %2396 = vmatpush3.bf16.msra.mxu0 %v2761_v37 }
  0xcc   : > { %2397 = vmatprep.subr.bf16.mxu0 %v2762_v38 }
  0xcf   : > { %2398 = vmatpush3.bf16.msra.mxu0 %v2763_v39 }
  0xd0   : > { %2399 = vmatprep.subr.bf16.mxu0 %v2764_v0 }
  0xd3   : > { %2400 = vmatpush3.bf16.msra.mxu0 %v2765_v15 }
  0xd4   : > { %2401 = vmatprep.subr.bf16.mxu0 %v2766_v42 }
  0xd7   : > { %2402 = vmatpush3.bf16.msra.mxu0 %v2767_v43 }
  0xd8   : > { %2403 = vmatprep.subr.bf16.mxu0 %v2768_v44 }
  0xdb   : > { %2404 = vmatpush3.bf16.msra.mxu0 %v2769_v45 }
  0xdc   : > { %2405 = vmatprep.subr.bf16.mxu0 %v2771_v46 }
  0xdf   : > { %2406 = vmatpush3.bf16.msra.mxu0 %v2772_v47 }
 0x102   : > { %v705_v56 = vpop.f32.mrf.mxu0 }
 0x103   : > { %v706_v62 = vadd.f32 %v705_v56, %v3404_v53 }
 0x104   : > { %v707_v58 = vpop.f32.mrf.mxu0 }
 0x105   : > { %v708_v61 = vadd.f32 %v707_v58, %v3399_v57  ;;  %v1057_v6 = vmax.f32 %v706_v62, 0.0  ;;  %v3417_v25 = vpop.f32.mrf.mxu1 }
 0x106   : > { %v709_v59 = vpop.f32.mrf.mxu0 }
 0x107   : > { %v710_v55 = vadd.f32 %v709_v59, %v3404_v53  ;;  %v1058_v4 = vmax.f32 %v708_v61, 0.0  ;;  %v3419_v8 = vpop.f32.mrf.mxu1 }
 0x108   : > { %v711_v63 = vpop.f32.mrf.mxu0 }
 0x109   : > { %v712_v1 = vadd.f32 %v711_v63, %v3399_v57  ;;  %v1061_v2 = vmax.f32 %v710_v55, 0.0  ;;  %v3424_v34 = vpop.f32.mrf.mxu1 }
 0x10a   : > { %v715_v3 = vpop.f32.mrf.mxu0 }
 0x10b   : > { %v1062_v5 = vmax.f32 %v712_v1, 0.0  ;;  %v1185_v10 = vpack.c.bf16 %v1061_v2, %v1057_v6  ;;  %v716_v16 = vadd.f32 %v715_v3, %v3404_v53  ;;  %v3427_v39 = vpop.f32.mrf.mxu1 }
 0x10c   : > { %v717_v7 = vpop.f32.mrf.mxu0 }
 0x10d   : > { %v1186_v9 = vpack.c.bf16 %v1062_v5, %v1058_v4  ;;  %v718_v13 = vadd.f32 %v717_v7, %v3399_v57  ;;  %v1065_v23 = vmax.f32 %v716_v16, 0.0  ;;  %v3431_v46 = vpop.f32.mrf.mxu1 }
 0x10e   : > { %v719_v12 = vpop.f32.mrf.mxu0 }
 0x10f   : > { %v720_v14 = vadd.f32 %v719_v12, %v3404_v53  ;;  %1805 = vmatprep.mubr.bf16.mxu0 %v1186_v9  ;;  %v1066_v21 = vmax.f32 %v718_v13, 0.0  ;;  %v3435_v58 = vpop.f32.mrf.mxu1 }
 0x110   : > { %v721_v17 = vpop.f32.mrf.mxu0  ;;  %1806 = vmatmul.mubr.bf16.vlgmr.msra.gmra.mxu0 %v1185_v10 }
 0x111   : > { %v722_v18 = vadd.f32 %v721_v17, %v3399_v57  ;;  %v1069_v19 = vmax.f32 %v720_v14, 0.0  ;;  %v3439_v2 = vpop.f32.mrf.mxu1 }
 0x112   : > { %v725_v20 = vpop.f32.mrf.mxu0 }
 0x113   : > { %v1070_v22 = vmax.f32 %v722_v18, 0.0  ;;  %v1189_v28 = vpack.c.bf16 %v1069_v19, %v1065_v23  ;;  %v726_v32 = vadd.f32 %v725_v20, %v3404_v53  ;;  %v3443_v12 = vpop.f32.mrf.mxu1 }
 0x114   : > { %v727_v24 = vpop.f32.mrf.mxu0 }
 0x115   : > { %v1190_v26 = vpack.c.bf16 %v1070_v22, %v1066_v21  ;;  %v728_v30 = vadd.f32 %v727_v24, %v3399_v57  ;;  %v1073_v0 = vmax.f32 %v726_v32, 0.0  ;;  %v3447_v21 = vpop.f32.mrf.mxu1 }
 0x116   : > { %v729_v29 = vpop.f32.mrf.mxu0 }
 0x117   : > { %v730_v31 = vadd.f32 %v729_v29, %v3404_v53  ;;  %1813 = vmatprep.mubr.bf16.mxu0 %v1190_v26  ;;  %v1074_v37 = vmax.f32 %v728_v30, 0.0 }
 0x118   : > { %v731_v33 = vpop.f32.mrf.mxu0  ;;  %1814 = vmatmul.mubr.bf16.gmra.mxu0 %v1189_v28 }
 0x119   : > { %v732_v11 = vadd.f32 %v731_v33, %v3399_v57  ;;  %v1077_v35 = vmax.f32 %v730_v31, 0.0  ;;  %v3451_v31 = vpop.f32.mrf.mxu1 }
 0x11a   : > { %v735_v36 = vpop.f32.mrf.mxu0 }
 0x11b   : > { %v1078_v38 = vmax.f32 %v732_v11, 0.0  ;;  %v1193_v42 = vpack.c.bf16 %v1077_v35, %v1073_v0  ;;  %v736_v47 = vadd.f32 %v735_v36, %v3404_v53  ;;  %v3455_v0 = vpop.f32.mrf.mxu1 }
 0x11c   : > { %v737_v40 = vpop.f32.mrf.mxu0 }
 0x11d   : > { %v1194_v15 = vpack.c.bf16 %v1078_v38, %v1074_v37  ;;  %v738_v44 = vadd.f32 %v737_v40, %v3399_v57  ;;  %v1081_v59 = vmax.f32 %v736_v47, 0.0 }
 0x11e   : > { %v739_v43 = vpop.f32.mrf.mxu0 }
 0x11f   : > { %v740_v45 = vadd.f32 %v739_v43, %v3404_v53  ;;  %1821 = vmatprep.mubr.bf16.mxu0 %v1194_v15  ;;  %v1082_v52 = vmax.f32 %v738_v44, 0.0 }
 0x120   : > { %v741_v27 = vpop.f32.mrf.mxu0  ;;  %1822 = vmatmul.mubr.bf16.gmra.mxu0 %v1193_v42 }
 0x121   : > { %v742_v48 = vadd.f32 %v741_v27, %v3399_v57  ;;  %v1085_v49 = vmax.f32 %v740_v45, 0.0  ;;  %v3459_v27 = vpop.f32.mrf.mxu1 }
 0x122   : > { %v745_v51 = vpop.f32.mrf.mxu0 }
 0x123   : > { %v1086_v56 = vmax.f32 %v742_v48, 0.0  ;;  %v1197_v55 = vpack.c.bf16 %v1085_v49, %v1081_v59  ;;  %v746_v3 = vadd.f32 %v745_v51, %v3404_v53 }
 0x124   : > { %v747_v60 = vpop.f32.mrf.mxu0 }
 0x125   : > { %v1198_v61 = vpack.c.bf16 %v1086_v56, %v1082_v52  ;;  %v748_v63 = vadd.f32 %v747_v60, %v3399_v57  ;;  %v1089_v13 = vmax.f32 %v746_v3, 0.0 }
 0x126   : > { %v749_v62 = vpop.f32.mrf.mxu0 }
 0x127   : > { %v750_v1 = vadd.f32 %v749_v62, %v3404_v53  ;;  %1829 = vmatprep.mubr.bf16.mxu0 %v1198_v61  ;;  %v1090_v9 = vmax.f32 %v748_v63, 0.0  ;;  %v3463_v61 = vpop.f32.mrf.mxu1 }
 0x128   : > { %v751_v4 = vpop.f32.mrf.mxu0  ;;  %1830 = vmatmul.mubr.bf16.gmra.mxu0 %v1197_v55 }
 0x129   : > { %v752_v5 = vadd.f32 %v751_v4, %v3399_v57  ;;  %v1093_v6 = vmax.f32 %v750_v1, 0.0 }
 0x12a   : > { %v755_v7 = vpop.f32.mrf.mxu0 }
 0x12b   : > { %v1094_v10 = vmax.f32 %v752_v5, 0.0  ;;  %v1201_v17 = vpack.c.bf16 %v1093_v6, %v1089_v13  ;;  %v756_v22 = vadd.f32 %v755_v7, %v3404_v53  ;;  %v3467_v6 = vpop.f32.mrf.mxu1 }
 0x12c   : > { %v757_v14 = vpop.f32.mrf.mxu0 }
 0x12d   : > { %v1202_v16 = vpack.c.bf16 %v1094_v10, %v1090_v9  ;;  %v758_v19 = vadd.f32 %v757_v14, %v3399_v57  ;;  %v1097_v32 = vmax.f32 %v756_v22, 0.0 }
 0x12e   : > { %v759_v18 = vpop.f32.mrf.mxu0 }
 0x12f   : > { %v760_v20 = vadd.f32 %v759_v18, %v3404_v53  ;;  %1837 = vmatprep.mubr.bf16.mxu0 %v1202_v16  ;;  %v1098_v29 = vmax.f32 %v758_v19, 0.0  ;;  %v3471_v18 = vpop.f32.mrf.mxu1 }
 0x130   : > { %v761_v23 = vpop.f32.mrf.mxu0  ;;  %1838 = vmatmul.mubr.bf16.gmra.mxu0 %v1201_v17 }
 0x131   : > { %v762_v24 = vadd.f32 %v761_v23, %v3399_v57  ;;  %v1101_v26 = vmax.f32 %v760_v20, 0.0 }
 0x132   : > { %v765_v28 = vpop.f32.mrf.mxu0 }
 0x133   : > { %v1102_v30 = vmax.f32 %v762_v24, 0.0  ;;  %v1205_v35 = vpack.c.bf16 %v1101_v26, %v1097_v32  ;;  %v766_v40 = vadd.f32 %v765_v28, %v3404_v53 }
 0x134   : > { %v767_v33 = vpop.f32.mrf.mxu0 }
 0x135   : > { %v1206_v11 = vpack.c.bf16 %v1102_v30, %v1098_v29  ;;  %v768_v37 = vadd.f32 %v767_v33, %v3399_v57  ;;  %v1105_v48 = vmax.f32 %v766_v40, 0.0  ;;  %v3475_v29 = vpop.f32.mrf.mxu1 }
 0x136   : > { %v769_v36 = vpop.f32.mrf.mxu0 }
 0x137   : > { %v770_v38 = vadd.f32 %v769_v36, %v3404_v53  ;;  %1845 = vmatprep.mubr.bf16.mxu0 %v1206_v11  ;;  %v1106_v45 = vmax.f32 %v768_v37, 0.0 }
 0x138   : > { %v771_v15 = vpop.f32.mrf.mxu0  ;;  %1846 = vmatmul.mubr.bf16.gmra.mxu0 %v1205_v35 }
 0x139   : > { %v772_v42 = vadd.f32 %v771_v15, %v3399_v57  ;;  %v1109_v43 = vmax.f32 %v770_v38, 0.0  ;;  %v3479_v38 = vpop.f32.mrf.mxu1 }
 0x13a   : > { %v775_v44 = vpop.f32.mrf.mxu0 }
 0x13b   : > { %v1110_v47 = vmax.f32 %v772_v42, 0.0  ;;  %v1209_v52 = vpack.c.bf16 %v1109_v43, %v1105_v48  ;;  %v776_v55 = vadd.f32 %v775_v44, %v3404_v53  ;;  %v3483_v48 = vpop.f32.mrf.mxu1 }
 0x13c   : > { %v777_v49 = vpop.f32.mrf.mxu0 }
 0x13d   : > { %v1210_v51 = vpack.c.bf16 %v1110_v47, %v1106_v45  ;;  %v778_v59 = vadd.f32 %v777_v49, %v3399_v57  ;;  %v1113_v7 = vmax.f32 %v776_v55, 0.0 }
 0x13e   : > { %v779_v56 = vpop.f32.mrf.mxu0 }
 0x13f   : > { %v780_v60 = vadd.f32 %v779_v56, %v3404_v53  ;;  %1853 = vmatprep.mubr.bf16.mxu0 %v1210_v51  ;;  %v1114_v4 = vmax.f32 %v778_v59, 0.0 }
 0x140   : > { %v781_v62 = vpop.f32.mrf.mxu0  ;;  %1854 = vmatmul.mubr.bf16.gmra.mxu0 %v1209_v52 }
 0x141   : > { %v782_v63 = vadd.f32 %v781_v62, %v3399_v57  ;;  %v1117_v1 = vmax.f32 %v780_v60, 0.0  ;;  %v3487_v62 = vpop.f32.mrf.mxu1 }
 0x142   : > { %v785_v3 = vpop.f32.mrf.mxu0 }
 0x143   : > { %v1118_v5 = vmax.f32 %v782_v63, 0.0  ;;  %v1213_v13 = vpack.c.bf16 %v1117_v1, %v1113_v7  ;;  %v786_v19 = vadd.f32 %v785_v3, %v3404_v53 }
 0x144   : > { %v787_v9 = vpop.f32.mrf.mxu0 }
 0x145   : > { %v1214_v10 = vpack.c.bf16 %v1118_v5, %v1114_v4  ;;  %v788_v16 = vadd.f32 %v787_v9, %v3399_v57  ;;  %v1121_v30 = vmax.f32 %v786_v19, 0.0 }
 0x146   : > { %v789_v14 = vpop.f32.mrf.mxu0 }
 0x147   : > { %v790_v17 = vadd.f32 %v789_v14, %v3404_v53  ;;  %1861 = vmatprep.mubr.bf16.mxu0 %v1214_v10  ;;  %v1122_v26 = vmax.f32 %v788_v16, 0.0  ;;  %v3491_v10 = vpop.f32.mrf.mxu1 }
 0x148   : > { %v791_v20 = vpop.f32.mrf.mxu0  ;;  %1862 = vmatmul.mubr.bf16.gmra.mxu0 %v1213_v13 }
 0x149   : > { %v792_v22 = vadd.f32 %v791_v20, %v3399_v57  ;;  %v1125_v23 = vmax.f32 %v790_v17, 0.0 }
 0x14a   : > { %v795_v24 = vpop.f32.mrf.mxu0 }
 0x14b   : > { %v1126_v28 = vmax.f32 %v792_v22, 0.0  ;;  %v1217_v11 = vpack.c.bf16 %v1125_v23, %v1121_v30  ;;  %v796_v40 = vadd.f32 %v795_v24, %v3404_v53  ;;  %v3495_v23 = vpop.f32.mrf.mxu1 }
 0x14c   : > { %v797_v32 = vpop.f32.mrf.mxu0 }
 0x14d   : > { %v1218_v33 = vpack.c.bf16 %v1126_v28, %v1122_v26  ;;  %v798_v36 = vadd.f32 %v797_v32, %v3399_v57  ;;  %v1129_v49 = vmax.f32 %v796_v40, 0.0 }
 0x14e   : > { %v799_v35 = vpop.f32.mrf.mxu0 }
 0x14f   : > { %v800_v37 = vadd.f32 %v799_v35, %v3404_v53  ;;  %1869 = vmatprep.mubr.bf16.mxu0 %v1218_v33  ;;  %v1130_v45 = vmax.f32 %v798_v36, 0.0  ;;  %v3499_v35 = vpop.f32.mrf.mxu1 }
 0x150   : > { %v801_v15 = vpop.f32.mrf.mxu0  ;;  %1870 = vmatmul.mubr.bf16.gmra.mxu0 %v1217_v11 }
 0x151   : > { %v802_v42 = vadd.f32 %v801_v15, %v3399_v57  ;;  %v1133_v43 = vmax.f32 %v800_v37, 0.0 }
 0x152   : > { %v805_v44 = vpop.f32.mrf.mxu0 }
 0x153   : > { %v1134_v47 = vmax.f32 %v802_v42, 0.0  ;;  %v1221_v56 = vpack.c.bf16 %v1133_v43, %v1129_v49  ;;  %v806_v63 = vadd.f32 %v805_v44, %v3404_v53 }
 0x154   : > { %v807_v51 = vpop.f32.mrf.mxu0 }
 0x155   : > { %v1222_v52 = vpack.c.bf16 %v1134_v47, %v1130_v45  ;;  %v808_v60 = vadd.f32 %v807_v51, %v3399_v57  ;;  %v1137_v13 = vmax.f32 %v806_v63, 0.0  ;;  %v3503_v45 = vpop.f32.mrf.mxu1 }
 0x156   : > { %v809_v59 = vpop.f32.mrf.mxu0 }
 0x157   : > { %v810_v55 = vadd.f32 %v809_v59, %v3404_v53  ;;  %1877 = vmatprep.mubr.bf16.mxu0 %v1222_v52  ;;  %v1138_v7 = vmax.f32 %v808_v60, 0.0 }
 0x158   : > { %v811_v1 = vpop.f32.mrf.mxu0  ;;  %1878 = vmatmul.mubr.bf16.gmra.mxu0 %v1221_v56 }
 0x159   : > { %v812_v3 = vadd.f32 %v811_v1, %v3399_v57  ;;  %v1141_v4 = vmax.f32 %v810_v55, 0.0  ;;  %v3507_v55 = vpop.f32.mrf.mxu1 }
 0x15a   : > { %v815_v5 = vpop.f32.mrf.mxu0 }
 0x15b   : > { %v1142_v9 = vmax.f32 %v812_v3, 0.0  ;;  %v1225_v17 = vpack.c.bf16 %v1141_v4, %v1137_v13  ;;  %v816_v24 = vadd.f32 %v815_v5, %v3404_v53  ;;  %v3511_v13 = vpop.f32.mrf.mxu1 }
 0x15c   : > { %v817_v14 = vpop.f32.mrf.mxu0 }
 0x15d   : > { %v1226_v16 = vpack.c.bf16 %v1142_v9, %v1138_v7  ;;  %v818_v20 = vadd.f32 %v817_v14, %v3399_v57  ;;  %v1145_v36 = vmax.f32 %v816_v24, 0.0 }
 0x15e   : > { %v819_v19 = vpop.f32.mrf.mxu0 }
 0x15f   : > { %v820_v22 = vadd.f32 %v819_v19, %v3404_v53  ;;  %1885 = vmatprep.mubr.bf16.mxu0 %v1226_v16  ;;  %v1146_v33 = vmax.f32 %v818_v20, 0.0 }
 0x160   : > { %v821_v26 = vpop.f32.mrf.mxu0  ;;  %1886 = vmatmul.mubr.bf16.gmra.mxu0 %v1225_v17 }
 0x161   : > { %v822_v28 = vadd.f32 %v821_v26, %v3399_v57  ;;  %v1149_v30 = vmax.f32 %v820_v22, 0.0  ;;  %v3515_v26 = vpop.f32.mrf.mxu1 }
 0x162   : > { %v825_v32 = vpop.f32.mrf.mxu0 }
 0x163   : > { %v1150_v11 = vmax.f32 %v822_v28, 0.0  ;;  %v1229_v15 = vpack.c.bf16 %v1149_v30, %v1145_v36  ;;  %v826_v47 = vadd.f32 %v825_v32, %v3404_v53  ;;  %v396_v36 = vsub.s32 3, %v3389_v50 }
 0x164   : > { %v827_v37 = vpop.f32.mrf.mxu0 }
 0x165   : > { %v1230_v40 = vpack.c.bf16 %v1150_v11, %v1146_v33  ;;  %v828_v43 = vadd.f32 %v827_v37, %v3399_v57  ;;  %v1153_v63 = vmax.f32 %v826_v47, 0.0 }
 0x166   : > { %v829_v42 = vpop.f32.mrf.mxu0 }
 0x167   : > { %v830_v44 = vadd.f32 %v829_v42, %v3404_v53  ;;  %1893 = vmatprep.mubr.bf16.mxu0 %v1230_v40  ;;  %v1154_v59 = vmax.f32 %v828_v43, 0.0 }
 0x168   : > { %v831_v49 = vpop.f32.mrf.mxu0  ;;  %1894 = vmatmul.mubr.bf16.gmra.mxu0 %v1229_v15  ;;  %v3520_v15 = vpop.f32.mrf.mxu1 }
 0x169   : > { %v832_v51 = vadd.f32 %v831_v49, %v3399_v57  ;;  %v1157_v52 = vmax.f32 %v830_v44, 0.0 }
 0x16a   : > { %v835_v56 = vpop.f32.mrf.mxu0 }
 0x16b   : > { %v1158_v60 = vmax.f32 %v832_v51, 0.0  ;;  %v1233_v4 = vpack.c.bf16 %v1157_v52, %v1153_v63  ;;  %v836_v14 = vadd.f32 %v835_v56, %v3404_v53  ;;  %v3525_v51 = vrot.slane %v3396_v41, %v396_v36 }
 0x16c   : > { %v837_v1 = vpop.f32.mrf.mxu0 }
 0x16d   : > { %v1234_v3 = vpack.c.bf16 %v1158_v60, %v1154_v59  ;;  %v838_v7 = vadd.f32 %v837_v1, %v3399_v57  ;;  %v1161_v28 = vmax.f32 %v836_v14, 0.0  ;;  %v3527_v59 = vpop.f32.mrf.mxu1 }
 0x16e   : > { %v839_v5 = vpop.f32.mrf.mxu0 }
 0x16f   : > { %v840_v9 = vadd.f32 %v839_v5, %v3404_v53  ;;  %1901 = vmatprep.mubr.bf16.mxu0 %v1234_v3  ;;  %v1162_v22 = vmax.f32 %v838_v7, 0.0  ;;  %v901_v5 = vadd.f32 %v3419_v8, %v3525_v51  ;;  %v905_v7 = vadd.f32 %v3427_v39, %v3525_v51 }
 0x170   : > { %v841_v16 = vpop.f32.mrf.mxu0  ;;  %1902 = vmatmul.mubr.bf16.gmra.mxu0 %v1233_v4 }
 0x171   : > { %v842_v17 = vadd.f32 %v841_v16, %v3399_v57  ;;  %v1165_v19 = vmax.f32 %v840_v9, 0.0  ;;  %v3535_v16 = vpop.f32.mrf.mxu1  ;;  %v1060_v39 = vmax.f32 %v901_v5, 0.0 }
 0x172   : > { %v845_v20 = vpop.f32.mrf.mxu0 }
 0x173   : > { %v1166_v24 = vmax.f32 %v842_v17, 0.0  ;;  %v1237_v33 = vpack.c.bf16 %v1165_v19, %v1161_v28  ;;  %v846_v42 = vadd.f32 %v845_v20, %v3404_v53  ;;  %v1355_v20 = vld [vmem:[%s4039_s4] sm:$0x1]  ;;  %v1064_v28 = vmax.f32 %v905_v7, 0.0 }
 0x174   : > { %v847_v30 = vpop.f32.mrf.mxu0  ;;  %v2787_v7 = vld [vmem:[%s4040_s5 + $0xa0] sm:$0xff]  }
 0x175   : > { %v1238_v32 = vpack.c.bf16 %v1166_v24, %v1162_v22  ;;  %v848_v37 = vadd.f32 %v847_v30, %v3399_v57  ;;  %v1169_v60 = vmax.f32 %v846_v42, 0.0 }
 0x176   : > { %v849_v11 = vpop.f32.mrf.mxu0 }
 0x177   : > { %v850_v40 = vadd.f32 %v849_v11, %v3404_v53  ;;  %1909 = vmatprep.mubr.bf16.mxu0 %v1238_v32  ;;  %v1170_v52 = vmax.f32 %v848_v37, 0.0  ;;  %v3542_v11 = vpop.f32.mrf.mxu1 }
 0x178   : > { %v851_v43 = vpop.f32.mrf.mxu0  ;;  %1910 = vmatmul.mubr.bf16.gmra.mxu0 %v1237_v33 }
 0x179   : > { %v852_v44 = vadd.f32 %v851_v43, %v3399_v57  ;;  %v1173_v47 = vmax.f32 %v850_v40, 0.0 }
 0x17a   : > { %v855_v49 = vpop.f32.mrf.mxu0 }
 0x17b   : > { %v1174_v56 = vmax.f32 %v852_v44, 0.0  ;;  %v1241_v3 = vpack.c.bf16 %v1173_v47, %v1169_v60  ;;  %v856_v17 = vadd.f32 %v855_v49, %v3404_v53  ;;  %v2781_v44 = vld [vmem:[%s4040_s5 + $0xb8] sm:$0xff]   ;;  %v2782_v49 = vld [vmem:[%s4040_s5 + $0xf0] sm:$0xff]  }
 0x17c   : > { %v857_v63 = vpop.f32.mrf.mxu0  ;;  %v2783_v60 = vld [vmem:[%s4040_s5 + $0xb0] sm:$0xff]  }
 0x17d   : > { %v1242_v1 = vpack.c.bf16 %v1174_v56, %v1170_v52  ;;  %v858_v9 = vadd.f32 %v857_v63, %v3399_v57  ;;  %v1177_v36 = vmax.f32 %v856_v17, 0.0  ;;  %v3550_v52 = vpop.f32.mrf.mxu1  ;;  %v2784_v63 = vld [vmem:[%s4040_s5 + $0xe8] sm:$0xff]   ;;  %v2789_v17 = vld [vmem:[%s4040_s5 + $0x98] sm:$0xff]  }
 0x17e   : > { %v859_v4 = vpop.f32.mrf.mxu0 }
 0x17f   : > { %v860_v14 = vadd.f32 %v859_v4, %v3404_v53  ;;  %1917 = vmatprep.mubr.bf16.mxu0 %v1242_v1  ;;  %v1178_v30 = vmax.f32 %v858_v9, 0.0  ;;  %v3558_v1 = vpop.f32.mrf.mxu1  ;;  %v2786_v4 = vld [vmem:[%s4040_s5 + $0xe0] sm:$0xff]   ;;  %v2788_v9 = vld [vmem:[%s4040_s5 + $0xd8] sm:$0xff]  }
 0x180   : > { %v861_v19 = vpop.f32.mrf.mxu0  ;;  %1918 = vmatmul.mubr.bf16.gmra.mxu0 %v1241_v3  ;;  %v2785_v3 = vld [vmem:[%s4040_s5 + $0xa8] sm:$0xff]  }
 0x181   : > { %v862_v8 = vadd.f32 %v861_v19, %v3399_v57  ;;  %v1181_v22 = vmax.f32 %v860_v14, 0.0  ;;  %v1188_v57 = vpack.c.bf16 %v1064_v28, %v1060_v39  ;;  %v3566_v5 = vpop.f32.mrf.mxu1  ;;  %v392_v19 = vsub.s32 2, %v3389_v50  ;;  %v2792_v39 = vld [vmem:[%s4040_s5 + $0xc8] sm:$0xff]  }
 0x182   : > { %v1397_v24 = vpop.f32.mrf.mxu0 }
 0x183   : > { %v1182_v32 = vmax.f32 %v862_v8, 0.0  ;;  %v1398_v33 = vadd.f32 %v1397_v24, %v1355_v20  ;;  %v1245_v42 = vpack.c.bf16 %v1181_v22, %v1177_v36  ;;  %v3574_v14 = vpop.f32.mrf.mxu1  ;;  %v2790_v20 = vld [vmem:[%s4040_s5 + $0xd0] sm:$0xff]   ;;  %v3589_v24 = vrot.slane %v3396_v41, %v392_v19 }
 0x184   : > { %v2619_v37 = vpop.f32.mrf.mxu0  ;;  %v2791_v22 = vld [vmem:[%s4040_s5 + $0x90] sm:$0xff]  }
 0x185   : > { %v1246_v53 = vpack.c.bf16 %v1182_v32, %v1178_v30  ;;  %v1403_v40 = vmax.f32 %v1398_v33, 0.0  ;;  %v3583_v8 = vpop.f32.mrf.mxu1  ;;  %v911_v30 = vadd.f32 %v3435_v58, %v3525_v51  ;;  %v2793_v32 = vld [vmem:[%s4040_s5 + $0x88] sm:$0xff]   ;;  %v915_v33 = vadd.f32 %v3443_v12, %v3525_v51  ;;  %v2794_v37 = vld [vmem:[%s4040_s5 + $0xc0] sm:$0xff]  }
 0x186   : > { %v1400_v43 = vpop.f32.mrf.mxu0  ;;  %v899_v41 = vadd.f32 %v3417_v25, %v3589_v24  ;;  %v903_v36 = vadd.f32 %v3424_v34, %v3589_v24  ;;  %v2795_v12 = vld [vmem:[%s4040_s5 + $0x80] sm:$0xff]   ;;  %v921_v34 = vadd.f32 %v3451_v31, %v3525_v51  ;;  %v923_v19 = vadd.f32 %v3455_v0, %v3589_v24 }
 0x187   : > { %v1405_v47 = vpack.c.bf16 %v1403_v40, %v1403_v40  ;;  %1925 = vmatprep.mubr.bf16.mxu0 %v1246_v53  ;;  %v3594_v28 = vpop.f32.mrf.mxu1  ;;  %v1068_v58 = vmax.f32 %v911_v30, 0.0  ;;  %v1072_v40 = vmax.f32 %v915_v33, 0.0  ;;  %v929_v0 = vadd.f32 %v3463_v61, %v3589_v24 }
 0x188   : > { %v2620_v56 = vpop.f32.mrf.mxu0  ;;  %1926 = vmatmul.mubr.bf16.gmra.mxu0 %v1245_v42  ;;  %v1059_v42 = vmax.f32 %v899_v41, 0.0  ;;  %v1063_v43 = vmax.f32 %v903_v36, 0.0  ;;  %v933_v36 = vadd.f32 %v3471_v18, %v3589_v24  ;;  %v955_v61 = vadd.f32 %v3507_v55, %v3525_v51 }
 0x189   : > { %2638 = vmatmul.mubr.bf16.vlgmr.msra.gmra.mxu1 %v1405_v47  ;;  %v3610_v53 = vpop.f32.mrf.mxu1  ;;  %v913_v56 = vadd.f32 %v3439_v2, %v3589_v24  ;;  %v919_v2 = vadd.f32 %v3447_v21, %v3589_v24  ;;  %v945_v21 = vadd.f32 %v3491_v10, %v3525_v51  ;;  %v951_v10 = vadd.f32 %v3499_v35, %v3525_v51 }
 0x18a   : > { %2504 = vmatpush3.bf16.msra.mxu1 %v2781_v44  ;;  %1966 = vmatprep.mubr.bf16.mxu1 %v1188_v57  ;;  %v1192_v44 = vpack.c.bf16 %v1072_v40, %v1068_v58  ;;  %v925_v57 = vadd.f32 %v3459_v27, %v3525_v51  ;;  %v1187_v47 = vpack.c.bf16 %v1063_v43, %v1059_v42  ;;  %v1087_v42 = vmax.f32 %v933_v36, 0.0 }
 0x18b   : > { %2505 = vmatprep.subr.bf16.mxu1 %v2782_v49  ;;  %v3615_v25 = vpop.f32.mrf.mxu1  ;;  %v909_v49 = vadd.f32 %v3431_v46, %v3589_v24  ;;  %v931_v27 = vadd.f32 %v3467_v6, %v3525_v51  ;;  %v935_v46 = vadd.f32 %v3475_v29, %v3525_v51  ;;  %v1075_v30 = vmax.f32 %v919_v2, 0.0 }
 0x18c   : > { %v941_v29 = vadd.f32 %v3483_v48, %v3525_v51  ;;  %v1096_v40 = vmax.f32 %v945_v21, 0.0  ;;  %v939_v18 = vadd.f32 %v3479_v38, %v3589_v24  ;;  %v961_v55 = vadd.f32 %v3515_v26, %v3525_v51 }
 0x18d   : > { %v965_v38 = vadd.f32 %v3527_v59, %v3525_v51  ;;  %v971_v59 = vadd.f32 %v3542_v11, %v3525_v51  ;;  %v973_v36 = vadd.f32 %v3550_v52, %v3589_v24  ;;  %v979_v52 = vadd.f32 %v3566_v5, %v3589_v24 }
 0x18e   : > { %2506 = vmatpush3.bf16.msra.mxu1 %v2783_v60  ;;  %v3625_v60 = vpop.f32.mrf.mxu1  ;;  %v1092_v58 = vmax.f32 %v941_v29, 0.0 }
 0x18f   : > { %2507 = vmatprep.subr.bf16.mxu1 %v2784_v63  ;;  %v1076_v63 = vmax.f32 %v921_v34, 0.0 }
 0x190   : > { %v3627_v31 = vpop.f32.mrf.mxu1  ;;  %v1204_v43 = vpack.c.bf16 %v1096_v40, %v1092_v58 }
 0x192   : > { %2508 = vmatpush3.bf16.msra.mxu1 %v2785_v3  ;;  %v1080_v3 = vmax.f32 %v925_v57, 0.0 }
 0x193   : > { %2509 = vmatprep.subr.bf16.mxu1 %v2786_v4  ;;  %v1067_v4 = vmax.f32 %v909_v49, 0.0  ;;  %v1104_v49 = vmax.f32 %v955_v61, 0.0  ;;  %v995_v61 = vadd.f32 %v3627_v31, %v3525_v51 }
 0x196   : > { %2510 = vmatpush3.bf16.msra.mxu1 %v2787_v7  ;;  %v1071_v7 = vmax.f32 %v913_v56, 0.0  ;;  %v1091_v56 = vmax.f32 %v939_v18, 0.0 }
 0x197   : > { %2511 = vmatprep.subr.bf16.mxu1 %v2788_v9  ;;  %v1196_v9 = vpack.c.bf16 %v1080_v3, %v1076_v63 }
 0x19a   : > { %2512 = vmatpush3.bf16.msra.mxu1 %v2789_v17  ;;  %v1191_v17 = vpack.c.bf16 %v1071_v7, %v1067_v4  ;;  %v953_v7 = vadd.f32 %v3503_v45, %v3589_v24  ;;  %v959_v45 = vadd.f32 %v3511_v13, %v3589_v24  ;;  %v985_v13 = vadd.f32 %v3594_v28, %v3525_v51 }
 0x19b   : > { %2513 = vmatprep.subr.bf16.mxu1 %v2790_v20  ;;  %v3637_v20 = vpop.f32.mrf.mxu1  ;;  %v991_v28 = vadd.f32 %v3615_v25, %v3525_v51 }
 0x19c   : > { %v1103_v2 = vmax.f32 %v953_v7, 0.0 }
 0x19d   : > { %v3639_v6 = vpop.f32.mrf.mxu1 }
 0x19e   : > { %2514 = vmatpush3.bf16.msra.mxu1 %v2791_v22  ;;  %v1084_v22 = vmax.f32 %v931_v27, 0.0  ;;  %v1001_v31 = vadd.f32 %v3639_v6, %v3525_v51 }
 0x19f   : > { %2515 = vmatprep.subr.bf16.mxu1 %v2792_v39  ;;  %v1088_v39 = vmax.f32 %v935_v46, 0.0  ;;  %v1112_v46 = vmax.f32 %v965_v38, 0.0  ;;  %v993_v38 = vadd.f32 %v3625_v60, %v3589_v24 }
 0x1a0   : > { %v1140_v7 = vmax.f32 %v1001_v31, 0.0 }
 0x1a1   : > { %v1200_v33 = vpack.c.bf16 %v1088_v39, %v1084_v22  ;;  %v975_v22 = vadd.f32 %v3558_v1, %v3525_v51  ;;  %v963_v39 = vadd.f32 %v3520_v15, %v3589_v24  ;;  %v981_v1 = vadd.f32 %v3574_v14, %v3525_v51 }
 0x1a2   : > { %2516 = vmatpush3.bf16.msra.mxu1 %v2793_v32  ;;  %v1079_v32 = vmax.f32 %v923_v19, 0.0  ;;  %v969_v15 = vadd.f32 %v3535_v16, %v3589_v24  ;;  %v1135_v6 = vmax.f32 %v993_v38, 0.0 }
 0x1a3   : > { %2517 = vmatprep.subr.bf16.mxu1 %v2794_v37  ;;  %v3649_v37 = vpop.f32.mrf.mxu1  ;;  %v1120_v29 = vmax.f32 %v975_v22, 0.0  ;;  %v1111_v21 = vmax.f32 %v963_v39, 0.0  ;;  %v1124_v40 = vmax.f32 %v981_v1, 0.0 }
 0x1a4   : > { %v1195_v41 = vpack.c.bf16 %v1079_v32, %v1075_v30  ;;  %v1116_v32 = vmax.f32 %v971_v59, 0.0  ;;  %v999_v59 = vadd.f32 %v3637_v20, %v3589_v24  ;;  %v1003_v22 = vadd.f32 %v3649_v37, %v3589_v24 }
 0x1a5   : > { %v3651_v48 = vpop.f32.mrf.mxu1 }
 0x1a6   : > { %2518 = vmatpush3.bf16.msra.mxu1 %v2795_v12  ;;  %v1083_v12 = vmax.f32 %v929_v0, 0.0  ;;  %v1216_v11 = vpack.c.bf16 %v1120_v29, %v1116_v32  ;;  %v1005_v5 = vadd.f32 %v3651_v48, %v3525_v51  ;;  %v1139_v29 = vmax.f32 %v999_v59, 0.0 }
 0x1a7   : > { %v3661_v57 = vpop.f32.mrf.mxu1 }
 0x1a8   : > { %v1199_v34 = vpack.c.bf16 %v1087_v42, %v1083_v12  ;;  %v1128_v12 = vmax.f32 %v985_v13, 0.0  ;;  %v1115_v42 = vmax.f32 %v969_v15, 0.0  ;;  %v1009_v37 = vadd.f32 %v3661_v57, %v3589_v24 }
 0x1a9   : > { %1967 = vmatmul.mubr.bf16.vlgmr.msra.gmra.mxu1 %v1187_v47  ;;  %v1100_v47 = vmax.f32 %v951_v10, 0.0  ;;  %v3663_v35 = vpop.f32.mrf.mxu1  ;;  %v1119_v10 = vmax.f32 %v973_v36, 0.0 }
 0x1aa   : > { %1974 = vmatprep.mubr.bf16.mxu1 %v1192_v44  ;;  %v943_v44 = vadd.f32 %v3487_v62, %v3589_v24  ;;  %v949_v62 = vadd.f32 %v3495_v23, %v3589_v24  ;;  %v1220_v14 = vpack.c.bf16 %v1128_v12, %v1124_v40  ;;  %v1147_v12 = vmax.f32 %v1009_v37, 0.0 }
 0x1ab   : > { %v1208_v3 = vpack.c.bf16 %v1104_v49, %v1100_v47  ;;  %v3673_v27 = vpop.f32.mrf.mxu1  ;;  %v1215_v16 = vpack.c.bf16 %v1119_v10, %v1115_v42  ;;  %v1136_v47 = vmax.f32 %v995_v61, 0.0  ;;  %v1123_v49 = vmax.f32 %v979_v52, 0.0 }
 0x1ac   : > { %v1095_v63 = vmax.f32 %v943_v44, 0.0  ;;  %v1132_v44 = vmax.f32 %v991_v28, 0.0  ;;  %v1013_v13 = vadd.f32 %v3673_v27, %v3589_v24 }
 0x1ad   : > { %v1014_v19 = vpop.f32.mrf.mxu1 }
 0x1ae   : > { %v1203_v4 = vpack.c.bf16 %v1095_v63, %v1091_v56  ;;  %v1151_v42 = vmax.f32 %v1013_v13, 0.0 }
 0x1af   : > { %v3683_v30 = vpop.f32.mrf.mxu1 }
 0x1b0   : > { %v1231_v28 = vpack.c.bf16 %v1151_v42, %v1147_v12  ;;  %v1019_v27 = vadd.f32 %v3683_v30, %v3589_v24 }
 0x1b1   : > { %1975 = vmatmul.mubr.bf16.gmra.mxu1 %v1191_v17  ;;  %v1099_v17 = vmax.f32 %v949_v62, 0.0 }
 0x1b2   : > { %1982 = vmatprep.mubr.bf16.mxu1 %v1196_v9  ;;  %v1108_v9 = vmax.f32 %v961_v55, 0.0 }
 0x1b3   : > { %v1207_v23 = vpack.c.bf16 %v1103_v2, %v1099_v17 }
 0x1b4   : > { %v1212_v26 = vpack.c.bf16 %v1112_v46, %v1108_v9  ;;  %v1144_v9 = vmax.f32 %v1005_v5, 0.0 }
 0x1b6   : > { %v1228_v48 = vpack.c.bf16 %v1144_v9, %v1140_v7 }
 0x1b9   : > { %1983 = vmatmul.mubr.bf16.gmra.mxu1 %v1195_v41  ;;  %v3685_v41 = vpop.f32.mrf.mxu1 }
 0x1ba   : > { %1990 = vmatprep.mubr.bf16.mxu1 %v1200_v33  ;;  %v1107_v33 = vmax.f32 %v959_v45, 0.0 }
 0x1bb   : > { %v3695_v58 = vpop.f32.mrf.mxu1 }
 0x1bc   : > { %v1211_v0 = vpack.c.bf16 %v1111_v21, %v1107_v33  ;;  %v1143_v33 = vmax.f32 %v1003_v22, 0.0  ;;  %v1023_v61 = vadd.f32 %v3695_v58, %v3589_v24 }
 0x1be   : > { %v1227_v1 = vpack.c.bf16 %v1143_v33, %v1139_v29 }
 0x1c1   : > { %1991 = vmatmul.mubr.bf16.gmra.mxu1 %v1199_v34  ;;  %v983_v34 = vadd.f32 %v3583_v8, %v3589_v24  ;;  %v989_v8 = vadd.f32 %v3610_v53, %v3589_v24  ;;  %v1011_v53 = vadd.f32 %v3663_v35, %v3525_v51 }
 0x1c2   : > { %1998 = vmatprep.mubr.bf16.mxu1 %v1204_v43  ;;  %v1024_v43 = vpop.f32.mrf.mxu1 }
 0x1c3   : > { %v1127_v56 = vmax.f32 %v983_v34, 0.0  ;;  %v1131_v46 = vmax.f32 %v989_v8, 0.0  ;;  %v1148_v39 = vmax.f32 %v1011_v53, 0.0  ;;  %v1025_v20 = vadd.f32 %v1024_v43, %v3525_v51 }
 0x1c4   : > { %v3705_v18 = vpop.f32.mrf.mxu1 }
 0x1c5   : > { %v1219_v55 = vpack.c.bf16 %v1127_v56, %v1123_v49  ;;  %v1223_v60 = vpack.c.bf16 %v1135_v6, %v1131_v46  ;;  %v1160_v40 = vmax.f32 %v1025_v20, 0.0  ;;  %v1159_v49 = vmax.f32 %v1023_v61, 0.0 }
 0x1c6   : > { %v1030_v63 = vpop.f32.mrf.mxu1  ;;  %v1029_v58 = vadd.f32 %v3705_v18, %v3589_v24 }
 0x1c8   : > { %v1163_v46 = vmax.f32 %v1029_v58, 0.0 }
 0x1c9   : > { %1999 = vmatmul.mubr.bf16.gmra.mxu1 %v1203_v4  ;;  %v3717_v4 = vpop.f32.mrf.mxu1 }
 0x1ca   : > { %2006 = vmatprep.mubr.bf16.mxu1 %v1208_v3  ;;  %v1224_v3 = vpack.c.bf16 %v1136_v47, %v1132_v44  ;;  %v1155_v47 = vmax.f32 %v1019_v27, 0.0 }
 0x1cb   : > { %v1034_v17 = vpop.f32.mrf.mxu1 }
 0x1cc   : > { %v1035_v57 = vadd.f32 %v1034_v17, %v3525_v51  ;;  %v1235_v5 = vpack.c.bf16 %v1159_v49, %v1155_v47 }
 0x1ce   : > { %v1168_v44 = vmax.f32 %v1035_v57, 0.0 }
 0x1d0   : > { %v3707_v25 = vpop.f32.mrf.mxu0 }
 0x1d1   : > { %2007 = vmatmul.mubr.bf16.gmra.mxu1 %v1207_v23  ;;  %v1038_v23 = vpop.f32.mrf.mxu1 }
 0x1d2   : > { %2014 = vmatprep.mubr.bf16.mxu1 %v1212_v26  ;;  %v3719_v62 = vpop.f32.mrf.mxu0  ;;  %v1015_v26 = vadd.f32 %v1014_v19, %v3525_v51 }
 0x1d3   : > { %v1040_v21 = vpop.f32.mrf.mxu1 }
 0x1d4   : > { %v3721_v2 = vpop.f32.mrf.mxu0  ;;  %v1152_v32 = vmax.f32 %v1015_v26, 0.0  ;;  %v1041_v31 = vadd.f32 %v1040_v21, %v3525_v51 }
 0x1d6   : > { %v3730_v45 = vpop.f32.mrf.mxu0  ;;  %v1232_v19 = vpack.c.bf16 %v1152_v32, %v1148_v39  ;;  %v1172_v7 = vmax.f32 %v1041_v31, 0.0 }
 0x1d7   : > { %v2412_v50 = vadd.f32 %v3730_v45, %v3721_v2 }
 0x1d8   : > { %v3732_v35 = vpop.f32.mrf.mxu0 }
 0x1d9   : > { %2015 = vmatmul.mubr.bf16.gmra.mxu1 %v1211_v0  ;;  %v1042_v0 = vpop.f32.mrf.mxu1 }
 0x1da   : > { %2022 = vmatprep.mubr.bf16.mxu1 %v1216_v11  ;;  %v1021_v11 = vadd.f32 %v3685_v41, %v3525_v51  ;;  %v3741_v15 = vpop.f32.mrf.mxu0  ;;  %v1043_v59 = vadd.f32 %v1042_v0, %v3589_v24 }
 0x1db   : > { %v1044_v10 = vpop.f32.mrf.mxu1 }
 0x1dc   : > { %v1156_v36 = vmax.f32 %v1021_v11, 0.0  ;;  %v3743_v41 = vpop.f32.mrf.mxu0  ;;  %v1045_v30 = vadd.f32 %v1044_v10, %v3525_v51  ;;  %v1175_v33 = vmax.f32 %v1043_v59, 0.0 }
 0x1de   : > { %v1236_v43 = vpack.c.bf16 %v1160_v40, %v1156_v36  ;;  %v3751_v52 = vpop.f32.mrf.mxu0  ;;  %v1176_v9 = vmax.f32 %v1045_v30, 0.0 }
 0x1e0   : > { %v1244_v53 = vpack.c.bf16 %v1176_v9, %v1172_v7 }
 0x1e1   : > { %2023 = vmatmul.mubr.bf16.gmra.mxu1 %v1215_v16  ;;  %v1048_v16 = vpop.f32.mrf.mxu1 }
 0x1e2   : > { %2030 = vmatprep.mubr.bf16.mxu1 %v1220_v14  ;;  %v1031_v14 = vadd.f32 %v1030_v63, %v3525_v51  ;;  %v3753_v63 = vpop.f32.mrf.mxu0  ;;  %v1049_v20 = vadd.f32 %v1048_v16, %v3589_v24 }
 0x1e3   : > { %v1050_v56 = vpop.f32.mrf.mxu1 }
 0x1e4   : > { %v1164_v34 = vmax.f32 %v1031_v14, 0.0  ;;  %v3761_v38 = vpop.f32.mrf.mxu0  ;;  %v1051_v26 = vadd.f32 %v1050_v56, %v3525_v51 }
 0x1e5   : > { %v1052_v8 = vpop.f32.mrf.mxu1 }
 0x1e6   : > { %v1180_v39 = vmax.f32 %v1051_v26, 0.0 }
 0x1e7   : > { %v1054_v17 = vpop.f32.mrf.mxu1 }
 0x1e8   : > { %v1055_v18 = vadd.f32 %v1054_v17, %v3525_v51  ;;  %v1053_v51 = vadd.f32 %v1052_v8, %v3589_v24 }
 0x1e9   : > { %2031 = vmatmul.mubr.bf16.gmra.mxu1 %v1219_v55  ;;  %v1033_v55 = vadd.f32 %v3717_v4, %v3589_v24  ;;  %v1039_v4 = vadd.f32 %v1038_v23, %v3589_v24  ;;  %v1179_v23 = vmax.f32 %v1049_v20, 0.0 }
 0x1ea   : > { %2038 = vmatprep.mubr.bf16.mxu1 %v1224_v3  ;;  %v1240_v3 = vpack.c.bf16 %v1168_v44, %v1164_v34  ;;  %v1184_v32 = vmax.f32 %v1055_v18, 0.0  ;;  %v1183_v37 = vmax.f32 %v1053_v51, 0.0  ;;  %v2418_v51 = vadd.f32 %v3751_v52, %v3743_v41 }
 0x1eb   : > { %v1167_v6 = vmax.f32 %v1033_v55, 0.0  ;;  %v1171_v29 = vmax.f32 %v1039_v4, 0.0 }
 0x1ec   : > { %v1247_v0 = vpack.c.bf16 %v1183_v37, %v1179_v23 }
 0x1ed   : > { %v1243_v11 = vpack.c.bf16 %v1175_v33, %v1171_v29 }
 0x1f1   : > { %2039 = vmatmul.mubr.bf16.gmra.mxu1 %v1223_v60  ;;  %v1239_v60 = vpack.c.bf16 %v1167_v6, %v1163_v46  ;;  %v2409_v46 = vadd.f32 %v3719_v62, %v3707_v25  ;;  %v2415_v62 = vadd.f32 %v3741_v15, %v3732_v35 }
 0x1f2   : > { %2046 = vmatprep.mubr.bf16.mxu1 %v1228_v48  ;;  %v3763_v48 = vpop.f32.mrf.mxu0 }
 0x1f4   : > { %v3769_v22 = vpop.f32.mrf.mxu0 }
 0x1f6   : > { %v3771_v21 = vpop.f32.mrf.mxu0 }
 0x1f9   : > { %2047 = vmatmul.mubr.bf16.gmra.mxu1 %v1227_v1  ;;  %v3775_v1 = vpop.f32.mrf.mxu0 }
 0x1fa   : > { %2054 = vmatprep.mubr.bf16.mxu1 %v1232_v19  ;;  %v1248_v19 = vpack.c.bf16 %v1184_v32, %v1180_v39 }
 0x1fb   : > { %v3777_v13 = vpop.f32.mrf.mxu0 }
 0x1fd   : > { %v3779_v36 = vpop.f32.mrf.mxu0 }
 0x1ff   : > { %v3781_v40 = vpop.f32.mrf.mxu0 }
 0x201   : > { %2055 = vmatmul.mubr.bf16.gmra.mxu1 %v1231_v28  ;;  %v3783_v12 = vpop.f32.mrf.mxu0 }
 0x202   : > { %2062 = vmatprep.mubr.bf16.mxu1 %v1236_v43 }
 0x203   : > { %v3785_v42 = vpop.f32.mrf.mxu0 }
 0x205   : > { %v3787_v10 = vpop.f32.mrf.mxu0 }
 0x207   : > { %v3789_v24 = vpop.f32.mrf.mxu0 }
 0x209   : > { %2063 = vmatmul.mubr.bf16.gmra.mxu1 %v1235_v5  ;;  %v3791_v43 = vpop.f32.mrf.mxu0  ;;  %v1404_v5 = vld [vmem:[%s4042_s7] sm:$0x1] }
 0x20a   : > { %2070 = vmatprep.mubr.bf16.mxu1 %v1240_v3 }
 0x20b   : > { %v3793_v14 = vpop.f32.mrf.mxu0 }
 0x20d   : > { %v3795_v57 = vpop.f32.mrf.mxu0 }
 0x20f   : > { %v3797_v28 = vpop.f32.mrf.mxu0 }
 0x211   : > { %2071 = vmatmul.mubr.bf16.gmra.mxu1 %v1239_v60  ;;  %v3799_v27 = vpop.f32.mrf.mxu0 }
 0x212   : > { %2078 = vmatprep.mubr.bf16.mxu1 %v1244_v53 }
 0x213   : > { %v3801_v34 = vpop.f32.mrf.mxu0 }
 0x215   : > { %v3803_v49 = vpop.f32.mrf.mxu0 }
 0x217   : > { %v3805_v56 = vpop.f32.mrf.mxu0 }
 0x219   : > { %2079 = vmatmul.mubr.bf16.gmra.mxu1 %v1243_v11  ;;  %v3807_v3 = vpop.f32.mrf.mxu0 }
 0x21a   : > { %2086 = vmatprep.mubr.bf16.mxu1 %v1248_v19 }
 0x21b   : > { %v3809_v31 = vpop.f32.mrf.mxu0 }
 0x21d   : > { %v3811_v30 = vpop.f32.mrf.mxu0 }
 0x21f   : > { %v3816_v55 = vpop.f32.mrf.mxu0 }
 0x221   : > { %2087 = vmatmul.mubr.bf16.gmra.mxu1 %v1247_v0  ;;  %v3822_v7 = vpop.f32.mrf.mxu0 }
 0x223   : > { %v3830_v26 = vpop.f32.mrf.mxu0 }
 0x225   : > { %v3835_v32 = vpop.f32.mrf.mxu0 }
 0x227   : > { %v3843_v11 = vpop.f32.mrf.mxu0 }
 0x249   : > { %v1504_v61 = vpop.f32.mrf.mxu1 }
 0x24a   : > { %v1510_v58 = vadd.f32 %v1504_v61, %v1404_v5  ;;  %v3849_v61 = vpop.f32.mrf.mxu0 }
 0x24b   : > { %v2639_v16 = vpop.f32.mrf.mxu1 }
 0x24c   : > { %v3820_v8 = vrot.slane %v1510_v58, %v384_v54 }
 0x24d   : > { %v1507_v44 = vpop.f32.mrf.mxu1 }
 0x24e   : > { %v1808_v17 = vadd.f32 %v2409_v46, %v3820_v8  ;;  %v1811_v4 = vadd.f32 %v2412_v50, %v3820_v8  ;;  %v1816_v2 = vadd.f32 %v2415_v62, %v3820_v8  ;;  %v1819_v23 = vadd.f32 %v2418_v51, %v3820_v8 }
 0x24f   : > { %v2640_v47 = vpop.f32.mrf.mxu1  ;;  %v2421_v44 = vadd.f32 %v3761_v38, %v3753_v63  ;;  %v2433_v51 = vadd.f32 %v3783_v12, %v3781_v40 }
 0x251   : > { %v1824_v41 = vadd.f32 %v2421_v44, %v3820_v8 }
 0x269   : > { %v2519_v9 = vpop.f32.mrf.mxu1 }
 0x26b   : > { %v2520_v6 = vpop.f32.mrf.mxu1 }
 0x26c   : > { %v2521_v53 = vadd.f32 %v2520_v6, %v2519_v9  ;;  %v3855_v9 = vpop.f32.mrf.mxu0  ;;  %v2424_v6 = vadd.f32 %v3769_v22, %v3763_v48 }
 0x26d   : > { %v2522_v18 = vpop.f32.mrf.mxu1 }
 0x26e   : > { %v1969_v54 = vadd.f32 %v2521_v53, %v1808_v17  ;;  %v1827_v63 = vadd.f32 %v2424_v6, %v3820_v8  ;;  %v3861_v50 = vpop.f32.mrf.mxu0 }
 0x26f   : > { %v2523_v60 = vpop.f32.mrf.mxu1 }
 0x270   : > { %v2095_v59 = vmax.f32 %v1969_v54, 0.0  ;;  %v2524_v39 = vadd.f32 %v2523_v60, %v2522_v18  ;;  %v2427_v60 = vadd.f32 %v3775_v1, %v3771_v21 }
 0x271   : > { %v2525_v25 = vpop.f32.mrf.mxu1 }
 0x272   : > { %2127 = vst [vmem:[%s3839_s20] sm:$0xff] %v2095_v59  ;;  %v1972_v29 = vadd.f32 %v2524_v39, %v1811_v4  ;;  %v1832_v48 = vadd.f32 %v2427_v60, %v3820_v8 }
 0x273   : > { %v2526_v33 = vpop.f32.mrf.mxu1 }
 0x274   : > { %v2096_v45 = vmax.f32 %v1972_v29, 0.0  ;;  %v2527_v19 = vadd.f32 %v2526_v33, %v2525_v25  ;;  %v3867_v25 = vpop.f32.mrf.mxu0  ;;  %v2430_v29 = vadd.f32 %v3779_v36, %v3777_v13  ;;  %v1840_v13 = vadd.f32 %v2433_v51, %v3820_v8 }
 0x275   : > { %v2528_v20 = vpop.f32.mrf.mxu1 }
 0x276   : > { %2128 = vst [vmem:[%s3839_s20 + $0x8] sm:$0xff] %v2096_v45  ;;  %v1977_v35 = vadd.f32 %v2527_v19, %v1816_v2  ;;  %v1835_v21 = vadd.f32 %v2430_v29, %v3820_v8  ;;  %v3873_v19 = vpop.f32.mrf.mxu0 }
 0x277   : > { %v2529_v15 = vpop.f32.mrf.mxu1 }
 0x278   : > { %v2097_v37 = vmax.f32 %v1977_v35, 0.0  ;;  %v2530_v0 = vadd.f32 %v2529_v15, %v2528_v20 }
 0x279   : > { %v2531_v16 = vpop.f32.mrf.mxu1 }
 0x27a   : > { %2129 = vst [vmem:[%s3839_s20 + $0x10] sm:$0xff] %v2097_v37  ;;  %v1980_v47 = vadd.f32 %v2530_v0, %v1819_v23  ;;  %v3879_v37 = vpop.f32.mrf.mxu0 }
 0x27b   : > { %v2532_v5 = vpop.f32.mrf.mxu1 }
 0x27c   : > { %v2098_v52 = vmax.f32 %v1980_v47, 0.0  ;;  %v2533_v58 = vadd.f32 %v2532_v5, %v2531_v16  ;;  %v2436_v16 = vadd.f32 %v3787_v10, %v3785_v42 }
 0x27d   : > { %v2534_v46 = vpop.f32.mrf.mxu1 }
 0x27e   : > { %2130 = vst [vmem:[%s3839_s20 + $0x18] sm:$0xff] %v2098_v52  ;;  %v1985_v17 = vadd.f32 %v2533_v58, %v1824_v41  ;;  %v1843_v40 = vadd.f32 %v2436_v16, %v3820_v8  ;;  %v3885_v41 = vpop.f32.mrf.mxu0  ;;  %v2439_v58 = vadd.f32 %v3791_v43, %v3789_v24  ;;  %v2454_v16 = vadd.f32 %v3811_v30, %v3809_v31 }
 0x27f   : > { %v2535_v53 = vpop.f32.mrf.mxu1 }
 0x280   : > { %v2099_v38 = vmax.f32 %v1985_v17, 0.0  ;;  %v2536_v18 = vadd.f32 %v2535_v53, %v2534_v46  ;;  %v1848_v42 = vadd.f32 %v2439_v58, %v3820_v8  ;;  %v3891_v53 = vpop.f32.mrf.mxu0 }
 0x281   : > { %v2537_v54 = vpop.f32.mrf.mxu1 }
 0x282   : > { %2131 = vst [vmem:[%s3839_s20 + $0x20] sm:$0xff] %v2099_v38  ;;  %v1988_v4 = vadd.f32 %v2536_v18, %v1827_v63  ;;  %v2442_v38 = vadd.f32 %v3795_v57, %v3793_v14 }
 0x283   : > { %v2538_v59 = vpop.f32.mrf.mxu1 }
 0x284   : > { %v2100_v22 = vmax.f32 %v1988_v4, 0.0  ;;  %v2539_v39 = vadd.f32 %v2538_v59, %v2537_v54  ;;  %v1851_v24 = vadd.f32 %v2442_v38, %v3820_v8  ;;  %v3897_v4 = vpop.f32.mrf.mxu0 }
 0x285   : > { %v2540_v62 = vpop.f32.mrf.mxu1 }
 0x286   : > { %2132 = vst [vmem:[%s3839_s20 + $0x28] sm:$0xff] %v2100_v22  ;;  %v1993_v33 = vadd.f32 %v2539_v39, %v1832_v48  ;;  %v2445_v48 = vadd.f32 %v3799_v27, %v3797_v28  ;;  %v3903_v29 = vpop.f32.mrf.mxu0 }
 0x287   : > { %v2541_v2 = vpop.f32.mrf.mxu1 }
 0x288   : > { %v2101_v1 = vmax.f32 %v1993_v33, 0.0  ;;  %v2542_v45 = vadd.f32 %v2541_v2, %v2540_v62  ;;  %v1856_v14 = vadd.f32 %v2445_v48, %v3820_v8  ;;  %v2448_v2 = vadd.f32 %v3803_v49, %v3801_v34 }
 0x289   : > { %v2543_v20 = vpop.f32.mrf.mxu1 }
 0x28a   : > { %2133 = vst [vmem:[%s3839_s20 + $0x30] sm:$0xff] %v2101_v1  ;;  %v1996_v35 = vadd.f32 %v2542_v45, %v1835_v21  ;;  %v1859_v28 = vadd.f32 %v2448_v2, %v3820_v8 }
 0x28b   : > { %v2544_v15 = vpop.f32.mrf.mxu1 }
 0x28c   : > { %v2102_v36 = vmax.f32 %v1996_v35, 0.0  ;;  %v2545_v23 = vadd.f32 %v2544_v15, %v2543_v20  ;;  %v3909_v20 = vpop.f32.mrf.mxu0  ;;  %v2451_v35 = vadd.f32 %v3807_v3, %v3805_v56  ;;  %v1867_v56 = vadd.f32 %v2454_v16, %v3820_v8 }
 0x28d   : > { %v2546_v0 = vpop.f32.mrf.mxu1  ;;  %v2475_v16 = vadd.f32 %v3897_v4, %v3891_v53 }
 0x28e   : > { %2134 = vst [vmem:[%s3839_s20 + $0x38] sm:$0xff] %v2102_v36  ;;  %v2001_v44 = vadd.f32 %v2545_v23, %v1840_v13  ;;  %v1864_v34 = vadd.f32 %v2451_v35, %v3820_v8  ;;  %v3915_v23 = vpop.f32.mrf.mxu0 }
 0x28f   : > { %v2547_v47 = vpop.f32.mrf.mxu1 }
 0x290   : > { %v2103_v12 = vmax.f32 %v2001_v44, 0.0  ;;  %v2548_v5 = vadd.f32 %v2547_v47, %v2546_v0 }
 0x291   : > { %v2549_v52 = vpop.f32.mrf.mxu1 }
 0x292   : > { %2135 = vst [vmem:[%s3839_s20 + $0x40] sm:$0xff] %v2103_v12  ;;  %v2004_v46 = vadd.f32 %v2548_v5, %v1843_v40  ;;  %v3921_v12 = vpop.f32.mrf.mxu0 }
 0x293   : > { %v2550_v6 = vpop.f32.mrf.mxu1 }
 0x294   : > { %v2104_v10 = vmax.f32 %v2004_v46, 0.0  ;;  %v2551_v17 = vadd.f32 %v2550_v6, %v2549_v52  ;;  %v2457_v52 = vadd.f32 %v3822_v7, %v3816_v55 }
 0x295   : > { %v2552_v63 = vpop.f32.mrf.mxu1 }
 0x296   : > { %2136 = vst [vmem:[%s3839_s20 + $0x48] sm:$0xff] %v2104_v10  ;;  %v2009_v18 = vadd.f32 %v2551_v17, %v1848_v42  ;;  %v1872_v31 = vadd.f32 %v2457_v52, %v3820_v8  ;;  %v3927_v42 = vpop.f32.mrf.mxu0  ;;  %v2460_v17 = vadd.f32 %v3835_v32, %v3830_v26 }
 0x297   : > { %v2553_v54 = vpop.f32.mrf.mxu1 }
 0x298   : > { %v2105_v43 = vmax.f32 %v2009_v18, 0.0  ;;  %v2554_v60 = vadd.f32 %v2553_v54, %v2552_v63  ;;  %v1875_v55 = vadd.f32 %v2460_v17, %v3820_v8  ;;  %v3933_v54 = vpop.f32.mrf.mxu0 }
 0x299   : > { %v2555_v59 = vpop.f32.mrf.mxu1 }
 0x29a   : > { %2137 = vst [vmem:[%s3839_s20 + $0x50] sm:$0xff] %v2105_v43  ;;  %v2012_v22 = vadd.f32 %v2554_v60, %v1851_v24  ;;  %v2463_v43 = vadd.f32 %v3849_v61, %v3843_v11 }
 0x29b   : > { %v2556_v39 = vpop.f32.mrf.mxu1 }
 0x29c   : > { %v2106_v57 = vmax.f32 %v2012_v22, 0.0  ;;  %v2557_v62 = vadd.f32 %v2556_v39, %v2555_v59  ;;  %v1880_v26 = vadd.f32 %v2463_v43, %v3820_v8  ;;  %v3939_v22 = vpop.f32.mrf.mxu0 }
 0x29d   : > { %v2558_v33 = vpop.f32.mrf.mxu1 }
 0x29e   : > { %2138 = vst [vmem:[%s3839_s20 + $0x58] sm:$0xff] %v2106_v57  ;;  %v2017_v21 = vadd.f32 %v2557_v62, %v1856_v14  ;;  %v2466_v14 = vadd.f32 %v3861_v50, %v3855_v9  ;;  %v2486_v2 = vpop.f32.mrf.mxu0 }
 0x29f   : > { %v2559_v1 = vpop.f32.mrf.mxu1 }
 0x2a0   : > { %v2107_v27 = vmax.f32 %v2017_v21, 0.0  ;;  %v2560_v45 = vadd.f32 %v2559_v1, %v2558_v33  ;;  %v1883_v11 = vadd.f32 %v2466_v14, %v3820_v8  ;;  %v2469_v1 = vadd.f32 %v3873_v19, %v3867_v25 }
 0x2a1   : > { %v2561_v51 = vpop.f32.mrf.mxu1 }
 0x2a2   : > { %2139 = vst [vmem:[%s3839_s20 + $0x60] sm:$0xff] %v2107_v27  ;;  %v2020_v15 = vadd.f32 %v2560_v45, %v1859_v28  ;;  %v1888_v45 = vadd.f32 %v2469_v1, %v3820_v8 }
 0x2a3   : > { %v2562_v13 = vpop.f32.mrf.mxu1 }
 0x2a4   : > { %v2108_v49 = vmax.f32 %v2020_v15, 0.0  ;;  %v2563_v36 = vadd.f32 %v2562_v13, %v2561_v51  ;;  %v2488_v51 = vpop.f32.mrf.mxu0  ;;  %v2472_v15 = vadd.f32 %v3885_v41, %v3879_v37 }
 0x2a5   : > { %v2564_v0 = vpop.f32.mrf.mxu1 }
 0x2a6   : > { %2140 = vst [vmem:[%s3839_s20 + $0x68] sm:$0xff] %v2108_v49  ;;  %v2025_v44 = vadd.f32 %v2563_v36, %v1864_v34  ;;  %v1891_v49 = vadd.f32 %v2472_v15, %v3820_v8  ;;  %v2489_v36 = vpop.f32.mrf.mxu0 }
 0x2a7   : > { %v2565_v47 = vpop.f32.mrf.mxu1 }
 0x2a8   : > { %v2109_v3 = vmax.f32 %v2025_v44, 0.0  ;;  %v2566_v40 = vadd.f32 %v2565_v47, %v2564_v0 }
 0x2a9   : > { %v2567_v5 = vpop.f32.mrf.mxu1 }
 0x2aa   : > { %2141 = vst [vmem:[%s3839_s20 + $0x70] sm:$0xff] %v2109_v3  ;;  %v2028_v58 = vadd.f32 %v2566_v40, %v1867_v56  ;;  %v1896_v56 = vadd.f32 %v2475_v16, %v3820_v8  ;;  %v2491_v3 = vpop.f32.mrf.mxu0 }
 0x2ab   : > { %v2568_v46 = vpop.f32.mrf.mxu1 }
 0x2ac   : > { %v2110_v30 = vmax.f32 %v2028_v58, 0.0  ;;  %v2569_v6 = vadd.f32 %v2568_v46, %v2567_v5  ;;  %v2478_v5 = vadd.f32 %v3909_v20, %v3903_v29 }
 0x2ad   : > { %v2570_v10 = vpop.f32.mrf.mxu1 }
 0x2ae   : > { %2142 = vst [vmem:[%s3839_s20 + $0x78] sm:$0xff] %v2110_v30  ;;  %v2033_v63 = vadd.f32 %v2569_v6, %v1872_v31  ;;  %v1899_v46 = vadd.f32 %v2478_v5, %v3820_v8  ;;  %v2492_v31 = vpop.f32.mrf.mxu0  ;;  %v2481_v6 = vadd.f32 %v3921_v12, %v3915_v23 }
 0x2af   : > { %v2571_v38 = vpop.f32.mrf.mxu1 }
 0x2b0   : > { %v2111_v7 = vmax.f32 %v2033_v63, 0.0  ;;  %v2572_v18 = vadd.f32 %v2571_v38, %v2570_v10  ;;  %v1904_v63 = vadd.f32 %v2481_v6, %v3820_v8  ;;  %v2494_v38 = vpop.f32.mrf.mxu0 }
 0x2b1   : > { %v2573_v24 = vpop.f32.mrf.mxu1 }
 0x2b2   : > { %2143 = vst [vmem:[%s3839_s20 + $0x80] sm:$0xff] %v2111_v7  ;;  %v2036_v60 = vadd.f32 %v2572_v18, %v1875_v55  ;;  %v2484_v7 = vadd.f32 %v3933_v54, %v3927_v42 }
 0x2b3   : > { %v2574_v59 = vpop.f32.mrf.mxu1 }
 0x2b4   : > { %v2112_v32 = vmax.f32 %v2036_v60, 0.0  ;;  %v2575_v48 = vadd.f32 %v2574_v59, %v2573_v24  ;;  %v1907_v43 = vadd.f32 %v2484_v7, %v3820_v8  ;;  %v2495_v60 = vpop.f32.mrf.mxu0 }
 0x2b5   : > { %v2576_v39 = vpop.f32.mrf.mxu1 }
 0x2b6   : > { %2144 = vst [vmem:[%s3839_s20 + $0x88] sm:$0xff] %v2112_v32  ;;  %v2041_v57 = vadd.f32 %v2575_v48, %v1880_v26  ;;  %v2487_v26 = vadd.f32 %v2486_v2, %v3939_v22  ;;  %v2497_v54 = vpop.f32.mrf.mxu0 }
 0x2b7   : > { %v2577_v62 = vpop.f32.mrf.mxu1 }
 0x2b8   : > { %v2113_v61 = vmax.f32 %v2041_v57, 0.0  ;;  %v2578_v33 = vadd.f32 %v2577_v62, %v2576_v39  ;;  %v1912_v39 = vadd.f32 %v2487_v26, %v3820_v8  ;;  %v2490_v62 = vadd.f32 %v2489_v36, %v2488_v51  ;;  %v2498_v22 = vpop.f32.mrf.mxu0 }
 0x2b9   : > { %v2579_v21 = vpop.f32.mrf.mxu1 }
 0x2ba   : > { %2145 = vst [vmem:[%s3839_s20 + $0x90] sm:$0xff] %v2113_v61  ;;  %v2044_v28 = vadd.f32 %v2578_v33, %v1883_v11  ;;  %v1915_v33 = vadd.f32 %v2490_v62, %v3820_v8  ;;  %v2500_v51 = vpop.f32.mrf.mxu0 }
 0x2bb   : > { %v2580_v27 = vpop.f32.mrf.mxu1 }
 0x2bc   : > { %v2114_v9 = vmax.f32 %v2044_v28, 0.0  ;;  %v2581_v50 = vadd.f32 %v2580_v27, %v2579_v21  ;;  %v2493_v28 = vadd.f32 %v2492_v31, %v2491_v3  ;;  %v2501_v16 = vpop.f32.mrf.mxu0 }
 0x2bd   : > { %v2582_v35 = vpop.f32.mrf.mxu1 }
 0x2be   : > { %2146 = vst [vmem:[%s3839_s20 + $0x98] sm:$0xff] %v2114_v9  ;;  %v2049_v13 = vadd.f32 %v2581_v50, %v1888_v45  ;;  %v1920_v9 = vadd.f32 %v2493_v28, %v3820_v8 }
 0x2bf   : > { %v2583_v34 = vpop.f32.mrf.mxu1 }
 0x2c0   : > { %v2115_v25 = vmax.f32 %v2049_v13, 0.0  ;;  %v2584_v19 = vadd.f32 %v2583_v34, %v2582_v35  ;;  %v2496_v13 = vadd.f32 %v2495_v60, %v2494_v38 }
 0x2c1   : > { %v2585_v0 = vpop.f32.mrf.mxu1 }
 0x2c2   : > { %2147 = vst [vmem:[%s3839_s20 + $0xa0] sm:$0xff] %v2115_v25  ;;  %v2052_v44 = vadd.f32 %v2584_v19, %v1891_v49  ;;  %v1923_v25 = vadd.f32 %v2496_v13, %v3820_v8  ;;  %v2499_v19 = vadd.f32 %v2498_v22, %v2497_v54 }
 0x2c3   : > { %v2586_v47 = vpop.f32.mrf.mxu1 }
 0x2c4   : > { %v2116_v37 = vmax.f32 %v2052_v44, 0.0  ;;  %v2587_v41 = vadd.f32 %v2586_v47, %v2585_v0 }
 0x2c5   : > { %v2588_v40 = vpop.f32.mrf.mxu1 }
 0x2c6   : > { %2148 = vst [vmem:[%s3839_s20 + $0xa8] sm:$0xff] %v2116_v37  ;;  %v2057_v52 = vadd.f32 %v2587_v41, %v1896_v56  ;;  %v1928_v37 = vadd.f32 %v2499_v19, %v3820_v8  ;;  %v2502_v41 = vadd.f32 %v2501_v16, %v2500_v51 }
 0x2c7   : > { %v2589_v58 = vpop.f32.mrf.mxu1 }
 0x2c8   : > { %v2117_v53 = vmax.f32 %v2057_v52, 0.0  ;;  %v2590_v4 = vadd.f32 %v2589_v58, %v2588_v40 }
 0x2c9   : > { %v2591_v30 = vpop.f32.mrf.mxu1 }
 0x2ca   : > { %2149 = vst [vmem:[%s3839_s20 + $0xb0] sm:$0xff] %v2117_v53  ;;  %v2060_v10 = vadd.f32 %v2590_v4, %v1899_v46  ;;  %v1931_v46 = vadd.f32 %v2502_v41, %v3820_v8 }
 0x2cb   : > { %v2592_v17 = vpop.f32.mrf.mxu1 }
 0x2cc   : > { %v2118_v29 = vmax.f32 %v2060_v10, 0.0  ;;  %v2593_v20 = vadd.f32 %v2592_v17, %v2591_v30 }
 0x2cd   : > { %v2594_v55 = vpop.f32.mrf.mxu1 }
 0x2ce   : > { %2150 = vst [vmem:[%s3839_s20 + $0xb8] sm:$0xff] %v2118_v29  ;;  %v2065_v18 = vadd.f32 %v2593_v20, %v1904_v63 }
 0x2cf   : > { %v2595_v24 = vpop.f32.mrf.mxu1 }
 0x2d0   : > { %v2119_v23 = vmax.f32 %v2065_v18, 0.0  ;;  %v2596_v12 = vadd.f32 %v2595_v24, %v2594_v55 }
 0x2d1   : > { %v2597_v59 = vpop.f32.mrf.mxu1 }
 0x2d2   : > { %2151 = vst [vmem:[%s3839_s20 + $0xc0] sm:$0xff] %v2119_v23  ;;  %v2068_v32 = vadd.f32 %v2596_v12, %v1907_v43 }
 0x2d3   : > { %v2598_v48 = vpop.f32.mrf.mxu1 }
 0x2d4   : > { %v2120_v14 = vmax.f32 %v2068_v32, 0.0  ;;  %v2599_v42 = vadd.f32 %v2598_v48, %v2597_v59 }
 0x2d5   : > { %v2600_v57 = vpop.f32.mrf.mxu1 }
 0x2d6   : > { %2152 = vst [vmem:[%s3839_s20 + $0xc8] sm:$0xff] %v2120_v14  ;;  %v2073_v11 = vadd.f32 %v2599_v42, %v1912_v39 }
 0x2d7   : > { %v2601_v61 = vpop.f32.mrf.mxu1 }
 0x2d8   : > { %v2121_v21 = vmax.f32 %v2073_v11, 0.0  ;;  %v2602_v1 = vadd.f32 %v2601_v61, %v2600_v57 }
 0x2d9   : > { %v2603_v2 = vpop.f32.mrf.mxu1 }
 0x2da   : > { %2153 = vst [vmem:[%s3839_s20 + $0xd0] sm:$0xff] %v2121_v21  ;;  %v2076_v27 = vadd.f32 %v2602_v1, %v1915_v33 }
 0x2db   : > { %v2604_v45 = vpop.f32.mrf.mxu1 }
 0x2dc   : > { %v2122_v50 = vmax.f32 %v2076_v27, 0.0  ;;  %v2605_v35 = vadd.f32 %v2604_v45, %v2603_v2 }
 0x2dd   : > { %v2606_v15 = vpop.f32.mrf.mxu1 }
 0x2de   : > { %2154 = vst [vmem:[%s3839_s20 + $0xd8] sm:$0xff] %v2122_v50  ;;  %v2081_v34 = vadd.f32 %v2605_v35, %v1920_v9 }
 0x2df   : > { %v2607_v49 = vpop.f32.mrf.mxu1 }
 0x2e0   : > { %v2123_v36 = vmax.f32 %v2081_v34, 0.0  ;;  %v2608_v0 = vadd.f32 %v2607_v49, %v2606_v15 }
 0x2e1   : > { %v2609_v44 = vpop.f32.mrf.mxu1 }
 0x2e2   : > { %2155 = vst [vmem:[%s3839_s20 + $0xe0] sm:$0xff] %v2123_v36  ;;  %v2084_v47 = vadd.f32 %v2608_v0, %v1923_v25 }
 0x2e3   : > { %v2610_v56 = vpop.f32.mrf.mxu1 }
 0x2e4   : > { %v2124_v3 = vmax.f32 %v2084_v47, 0.0  ;;  %v2611_v40 = vadd.f32 %v2610_v56, %v2609_v44 }
 0x2e5   : > { %v2612_v5 = vpop.f32.mrf.mxu1 }
 0x2e6   : > { %2156 = vst [vmem:[%s3839_s20 + $0xe8] sm:$0xff] %v2124_v3  ;;  %v2089_v52 = vadd.f32 %v2611_v40, %v1928_v37 }
 0x2e7   : > { %v2613_v58 = vpop.f32.mrf.mxu1 }
 0x2e8   : > { %v2125_v53 = vmax.f32 %v2089_v52, 0.0  ;;  %v2614_v4 = vadd.f32 %v2613_v58, %v2612_v5 }
 0x2ea   : > { %2157 = vst [vmem:[%s3839_s20 + $0xf0] sm:$0xff] %v2125_v53  ;;  %v2092_v31 = vadd.f32 %v2614_v4, %v1931_v46 }
 0x2ec   : > { %v2126_v30 = vmax.f32 %v2092_v31, 0.0 }
 0x2ee   : > { %2158 = vst [vmem:[%s3839_s20 + $0xf8] sm:$0xff] %v2126_v30 }
 0x2ef   : > { %2851 = shalt.err (!%p2848_p0)
}
 0x2f0   : > { %s2852_s17 = scalar_lea.hbm %s3988_s26, 4096  ;;  %s2856_s20 = scalar_lea.hbm %s4043_s8, 8192 }
 0x2f1   : > { %p2853_p1 = scmp.ne.s32.totalorder %s3988_s26, %s2852_s17  ;;  %p2857_p4 = scmp.lt.s32.totalorder %s3988_s26, %s4043_s8 }
 0x2f2   : > { %p2858_p7 = scmp.lt.s32.totalorder %s2856_s20, %s2852_s17 }
 0x2f3   : > { %p2854_p2 = pnand %p2853_p1, %p2996_p5 }
 0x2f4   : > { %p2859_p6 = por %p2858_p7, %p2857_p4 }
 0x2f5   : > { %p2855_p3 = pneg %p2854_p2 }
 0x2f7   : > { %p2860_p8 = pnand %p2859_p6, %p2855_p3 }
 0x2f9   : > { %2863 = shalt.err (!%p2860_p8)
}
 0x2fa   : > { %s2911_s24 = smov 128   ;;  %s2912_s13 = smov 8  }
 0x2fb   : > { %2645 = dma.vmem_to_hbm [thread:$0]  (%p2996_p5), %s3990_s22, 4096, %s3988_s26, %s3995_s12, %s2911_s24, %s2911_s24, %s2912_s13  }
 0x2fc PF: > { %p2657_p9 = scmp.ge.s32.totalorder %s2902_s30, 2  ;;  %s2188_s9 = sand.u32 1, %s2890_s27  }
 0x2fd   : > { %p4047_p10 = scmp.ne.s32.totalorder %s4045_s16, 0  ;;  %s2189_s10 = scalar_lea.sflag [#allocation4], %s2188_s9 }
 0x2ff   : > { %p2652_p11 = pnand %p2657_p9, %p4047_p10 }
 0x301   : > { %p2653_p12 = pneg %p2652_p11 }
 0x303   : > { %2885 = dma.done.wait (%p2653_p12), %s2189_s10, 4096  }
 0x304   : > { %2887 = vsyncadd (%p2653_p12), %s2189_s10, 4294963200  ;;  %p19_p13 = scmp.ge.s32.totalorder %s2983_s11, 4   ;;  %s4048_s27 = smov %s2894_s28 }
 0x305   : > { %s4049_s28 = smov %s2898_s29  ;;  %s4050_s29 = smov %s2994_s14 }
 0x306   : > { %s4051_s30 = smov %s2983_s11  ;;  %21 = sbr.rel (!%p19_p13) target bundleno = 4 (0x4), region = 92 }
 0x30b   :  { %2194 = vsyncpa [#allocation3], 1 }
 0x30c   :  { %2196 = vsyncpa [#allocation3 + $0x1], 1 }
 0x30d   :  { %2197 = vsyncpa [#allocation4], 1 }
 0x30e   :  { %2199 = vsyncpa [#allocation4 + $0x1], 1 }

</bundles_post_ra>
